<compile_context>
chip_gen: v7x
topology: tpu7x:2x2x1
jax: 0.10.0
libtpu: 0.0.40
codegen_flags: <defaults>
</compile_context>

<pallas_src>
import jax
import jax.numpy as jnp
from jax import lax
from jax.experimental import pallas as pl
from jax.experimental.pallas import tpu as pltpu
import numpy as np


def _fused_lstm_kernel(w_ref, x_ref, atte_ref, out_ref, state_ref):
    # w_ref   : SMEM f32[24]  = [l1: wih(4), whh(4), b(4) | l2: same], gate
    #           order (i, f, g, o); sigmoid rows pre-scaled by 0.5.
    # x_ref, atte_ref, out_ref : VMEM f32[TS, 1, R, 128]  (time-chunk tile)
    # state_ref : VMEM f32[4, R, 128] -> rows h1, c1, h2, c2 (carried across
    #             seq chunks for the current batch tile).
    TS = x_ref.shape[0]
    R = x_ref.shape[2]
    s = pl.program_id(1)

    # ---- weights: 24 SMEM scalar reads; lane-broadcast hoisted out of loop ----
    def gate_slab(base):
        rows = [jnp.full((1, 1, 128), w_ref[base + k], dtype=jnp.float32)
                for k in range(4)]
        return jnp.concatenate(rows, axis=0)          # (4, 1, 128)

    wih1, whh1, b1 = gate_slab(0), gate_slab(4), gate_slab(8)
    wih2, whh2, b2 = gate_slab(12), gate_slab(16), gate_slab(20)

    @pl.when(s == 0)
    def _():
        state_ref[...] = jnp.zeros_like(state_ref)

    def cell(xt, h, c, wih, whh, b):
        # Single-layer cell: used only for the per-chunk prologue / epilogue.
        z = wih * xt[None] + whh * h[None] + b        # (4, R, 128)
        th = jnp.tanh(z)                              # one EUP slab
        i = 0.5 * (th[0] + 1.0)                       # sigmoid via tanh identity
        f = 0.5 * (th[1] + 1.0)
        g = th[2]
        o = 0.5 * (th[3] + 1.0)
        c_new = f * c + i * g
        h_new = o * jnp.tanh(c_new)
        return h_new, c_new

    h1 = state_ref[0, :, :]
    c1 = state_ref[1, :, :]
    h2 = state_ref[2, :, :]
    c2 = state_ref[3, :, :]

    # Chunk prologue: advance lstm1 to this chunk's first timestep.
    h1, c1 = cell(x_ref[0, 0, :, :], h1, c1, wih1, whh1, b1)

    def body(r, carry):
        h1, c1, h2, c2 = carry
        # lstm2 input at local time r (independent of lstm1 at r+1 -> skew).
        x2 = h1 * atte_ref[r, 0, :, :]
        x1 = x_ref[r + 1, 0, :, :]
        # Fused gate pre-activations for both layers -> single tanh slab.
        z1 = wih1 * x1[None] + whh1 * h1[None] + b1   # (4, R, 128)
        z2 = wih2 * x2[None] + whh2 * h2[None] + b2
        th = jnp.tanh(jnp.concatenate([z1, z2], axis=0))   # (8, R, 128)
        i1 = 0.5 * (th[0] + 1.0); f1 = 0.5 * (th[1] + 1.0)
        g1 = th[2];               o1 = 0.5 * (th[3] + 1.0)
        i2 = 0.5 * (th[4] + 1.0); f2 = 0.5 * (th[5] + 1.0)
        g2 = th[6];               o2 = 0.5 * (th[7] + 1.0)
        c1n = f1 * c1 + i1 * g1
        c2n = f2 * c2 + i2 * g2
        tc = jnp.tanh(jnp.stack([c1n, c2n], axis=0))       # (2, R, 128)
        h1n = o1 * tc[0]
        h2n = o2 * tc[1]
        out_ref[r, 0, :, :] = h2n
        return h1n, c1n, h2n, c2n

    unroll_amt = max(1, min(4 if R >= 8 else 8, TS - 1))
    h1, c1, h2, c2 = lax.fori_loop(0, TS - 1, body, (h1, c1, h2, c2),
                                   unroll=unroll_amt)

    # Chunk epilogue: lstm2 at this chunk's last timestep (lstm1 for the next
    # timestep is handled by the next chunk's prologue).
    x2 = h1 * atte_ref[TS - 1, 0, :, :]
    h2, c2 = cell(x2, h2, c2, wih2, whh2, b2)
    out_ref[TS - 1, 0, :, :] = h2

    # Carry recurrent state to the next seq chunk.
    state_ref[0, :, :] = h1
    state_ref[1, :, :] = c1
    state_ref[2, :, :] = h2
    state_ref[3, :, :] = c2


def _pack_weights(params_flat):
    """f32[32] PyTorch params -> f32[24] SMEM slab, sigmoid rows pre-scaled."""
    scale = jnp.array([0.5, 0.5, 1.0, 0.5], jnp.float32)  # (i, f, g, o)

    def layer(l):
        base = 16 * l
        wih = params_flat[base:base + 4] * scale
        whh = params_flat[base + 4:base + 8] * scale
        b = (params_flat[base + 8:base + 12] +
             params_flat[base + 12:base + 16]) * scale
        return jnp.concatenate([wih, whh, b])

    return jnp.concatenate([layer(0), layer(1)]).astype(jnp.float32)  # (24,)


def _choose_batch_tiling(batch):
    """Return (R, n_batch_tiles): per-tile sublane-tile count and tile count."""
    lane_tiles = max(1, -(-batch // 128))
    two_tc = False
    try:
        kind = jax.devices()[0].device_kind.lower()
        two_tc = ("v7" in kind) or ("7x" in kind)
    except Exception:
        pass
    # v7x: force >=2 batch tiles so the "parallel" axis shards across both TCs.
    min_tiles = 2 if (two_tc and lane_tiles >= 2) else 1
    nbt = max(min_tiles, -(-lane_tiles // 8))   # cap: 8 sublane-tiles (1024 lanes)/tile
    r = -(-lane_tiles // nbt)
    nbt = -(-lane_tiles // r)
    return r, nbt


def lstm_forward(params_flat, x, indicator, ideal_atte_x):
    """x, indicator, ideal_atte_x: (batch, seq) -> output (batch, seq) f32."""
    batch, seq = x.shape
    r, nbt = _choose_batch_tiling(batch)
    bp = nbt * r * 128                        # padded batch (lane-aligned)
    ts = min(seq, 256)                        # seq-chunk length
    seq_p = -(-seq // ts) * ts                # padded seq (multiple of chunk)

    # Attention hoisted out of the recurrence; XLA fuses abs/sub/transpose/pad.
    atte = jnp.abs(indicator - ideal_atte_x)

    def prep(a):
        a = jnp.pad(a.T.astype(jnp.float32),
                    ((0, seq_p - seq), (0, bp - batch)))
        return a.reshape(seq_p, nbt, r, 128)

    xs = prep(x)
    attes = prep(atte)
    w_packed = _pack_weights(params_flat)

    w_spec = pl.BlockSpec(memory_space=pltpu.MemorySpace.SMEM)
    data_spec = pl.BlockSpec((ts, 1, r, 128), lambda j, s: (s, j, 0, 0))

    block_bytes = ts * r * 128 * 4
    vmem_need = 3 * 2 * block_bytes + (4 << 20)      # x+atte+out, double-buffered
    vmem_limit = int(min(max(vmem_need, 32 << 20), 48 << 20))

    out = pl.pallas_call(
        _fused_lstm_kernel,
        out_shape=jax.ShapeDtypeStruct((seq_p, nbt, r, 128), jnp.float32),
        grid=(nbt, seq_p // ts),
        in_specs=[w_spec, data_spec, data_spec],
        out_specs=data_spec,
        scratch_shapes=[pltpu.VMEM((4, r, 128), jnp.float32)],
        compiler_params=pltpu.CompilerParams(
            dimension_semantics=("parallel", "arbitrary"),
            vmem_limit_bytes=vmem_limit),
    )(w_packed, xs, attes)

    return out.reshape(seq_p, bp)[:seq, :batch].T


def init_params(key):
    # nn.LSTM(1, 1): weight_ih_l0 (4,1), weight_hh_l0 (4,1), bias_ih_l0 (4,),
    # bias_hh_l0 (4,); PyTorch init U(-1/sqrt(hidden), 1/sqrt(hidden)) = U(-1,1).
    ks = jax.random.split(key, 8)
    parts = [jax.random.uniform(ks[i], (4,), jnp.float32, -1.0, 1.0)
             for i in range(8)]
    return jnp.concatenate(parts)  # f32[32]: [l1: wih, whh, bih, bhh | l2: ...]


def lstm_ref(params_flat, x, indicator, ideal_atte_x):
    """Pure-JAX reference of the PyTorch forward (for correctness check)."""
    def unpack(layer):
        b = layer * 16
        return (params_flat[b:b + 4], params_flat[b + 4:b + 8],
                params_flat[b + 8:b + 12], params_flat[b + 12:b + 16])

    def run(xs, p):  # xs: (seq, batch)
        w_ih, w_hh, b_ih, b_hh = p
        b = b_ih + b_hh

        def step(carry, xt):
            h, c = carry
            i = jax.nn.sigmoid(w_ih[0] * xt + w_hh[0] * h + b[0])
            f = jax.nn.sigmoid(w_ih[1] * xt + w_hh[1] * h + b[1])
            g = jnp.tanh(w_ih[2] * xt + w_hh[2] * h + b[2])
            o = jax.nn.sigmoid(w_ih[3] * xt + w_hh[3] * h + b[3])
            c = f * c + i * g
            h = o * jnp.tanh(c)
            return (h, c), h

        z = jnp.zeros((xs.shape[1],), jnp.float32)
        _, hs = lax.scan(step, (z, z), xs)
        return hs

    emb = run(x.T, unpack(0)).T                      # (batch, seq)
    atte = jnp.abs(indicator - ideal_atte_x)
    out = run((emb * atte).T, unpack(1)).T
    return out


if __name__ == "__main__":
    key = jax.random.PRNGKey(0)
    kp, kx, ki, kd = jax.random.split(key, 4)

    batch, seq = 2, 8
    params = init_params(kp)
    x = jax.random.normal(kx, (batch, seq), jnp.float32)
    indicator = jax.random.normal(ki, (batch, seq), jnp.float32)
    ideal_atte_x = jax.random.normal(kd, (batch, seq), jnp.float32)

    out = lstm_forward(params, x, indicator, ideal_atte_x)
    out = jax.block_until_ready(out)

    ref = lstm_ref(params, x, indicator, ideal_atte_x)
    np.testing.assert_allclose(np.asarray(out), np.asarray(ref),
                               rtol=1e-5, atol=1e-5)
    print("KERNEL_OK")
</pallas_src>

<mosaic_0001>
module attributes {stable_mosaic.version = 11 : i64} {
  func.func @_fused_lstm_kernel(%arg0: i32, %arg1: i32, %arg2: memref<24xf32, #tpu.memory_space<smem>>, %arg3: memref<8x1x1x128xf32, #tpu.memory_space<vmem>>, %arg4: memref<8x1x1x128xf32, #tpu.memory_space<vmem>>, %arg5: memref<8x1x1x128xf32, #tpu.memory_space<vmem>>, %arg6: memref<4x1x128xf32, #tpu.memory_space<vmem>>) attributes {dimension_semantics = [#tpu.dimension_semantics<parallel>, #tpu.dimension_semantics<arbitrary>], iteration_bounds = array<i64: 1, 1>, scalar_prefetch = 0 : i64, scratch_operands = 1 : i64, tpu.core_type = #tpu.core_type<tc>, window_params = [{transform_indices = @transform_0, window_bounds = array<i64: 24>}, {transform_indices = @transform_1, window_bounds = array<i64: 8, 1, 1, 128>}, {transform_indices = @transform_2, window_bounds = array<i64: 8, 1, 1, 128>}, {transform_indices = @transform_3, window_bounds = array<i64: 8, 1, 1, 128>}]} {
    %c0 = arith.constant 0 : index
    %0 = memref.load %arg2[%c0] : memref<24xf32, #tpu.memory_space<smem>>
    %1 = vector.broadcast %0 : f32 to vector<1x1x128xf32>
    %c1 = arith.constant 1 : index
    %2 = memref.load %arg2[%c1] : memref<24xf32, #tpu.memory_space<smem>>
    %3 = vector.broadcast %2 : f32 to vector<1x1x128xf32>
    %c2 = arith.constant 2 : index
    %4 = memref.load %arg2[%c2] : memref<24xf32, #tpu.memory_space<smem>>
    %5 = vector.broadcast %4 : f32 to vector<1x1x128xf32>
    %c3 = arith.constant 3 : index
    %6 = memref.load %arg2[%c3] : memref<24xf32, #tpu.memory_space<smem>>
    %7 = vector.broadcast %6 : f32 to vector<1x1x128xf32>
    %8 = tpu.concatenate %1, %3, %5, %7 in 0 : vector<1x1x128xf32>, vector<1x1x128xf32>, vector<1x1x128xf32>, vector<1x1x128xf32> -> vector<4x1x128xf32>
    %c4 = arith.constant 4 : index
    %9 = memref.load %arg2[%c4] : memref<24xf32, #tpu.memory_space<smem>>
    %10 = vector.broadcast %9 : f32 to vector<1x1x128xf32>
    %c5 = arith.constant 5 : index
    %11 = memref.load %arg2[%c5] : memref<24xf32, #tpu.memory_space<smem>>
    %12 = vector.broadcast %11 : f32 to vector<1x1x128xf32>
    %c6 = arith.constant 6 : index
    %13 = memref.load %arg2[%c6] : memref<24xf32, #tpu.memory_space<smem>>
    %14 = vector.broadcast %13 : f32 to vector<1x1x128xf32>
    %c7 = arith.constant 7 : index
    %15 = memref.load %arg2[%c7] : memref<24xf32, #tpu.memory_space<smem>>
    %16 = vector.broadcast %15 : f32 to vector<1x1x128xf32>
    %17 = tpu.concatenate %10, %12, %14, %16 in 0 : vector<1x1x128xf32>, vector<1x1x128xf32>, vector<1x1x128xf32>, vector<1x1x128xf32> -> vector<4x1x128xf32>
    %c8 = arith.constant 8 : index
    %18 = memref.load %arg2[%c8] : memref<24xf32, #tpu.memory_space<smem>>
    %19 = vector.broadcast %18 : f32 to vector<1x1x128xf32>
    %c9 = arith.constant 9 : index
    %20 = memref.load %arg2[%c9] : memref<24xf32, #tpu.memory_space<smem>>
    %21 = vector.broadcast %20 : f32 to vector<1x1x128xf32>
    %c10 = arith.constant 10 : index
    %22 = memref.load %arg2[%c10] : memref<24xf32, #tpu.memory_space<smem>>
    %23 = vector.broadcast %22 : f32 to vector<1x1x128xf32>
    %c11 = arith.constant 11 : index
    %24 = memref.load %arg2[%c11] : memref<24xf32, #tpu.memory_space<smem>>
    %25 = vector.broadcast %24 : f32 to vector<1x1x128xf32>
    %26 = tpu.concatenate %19, %21, %23, %25 in 0 : vector<1x1x128xf32>, vector<1x1x128xf32>, vector<1x1x128xf32>, vector<1x1x128xf32> -> vector<4x1x128xf32>
    %c12 = arith.constant 12 : index
    %27 = memref.load %arg2[%c12] : memref<24xf32, #tpu.memory_space<smem>>
    %28 = vector.broadcast %27 : f32 to vector<1x1x128xf32>
    %c13 = arith.constant 13 : index
    %29 = memref.load %arg2[%c13] : memref<24xf32, #tpu.memory_space<smem>>
    %30 = vector.broadcast %29 : f32 to vector<1x1x128xf32>
    %c14 = arith.constant 14 : index
    %31 = memref.load %arg2[%c14] : memref<24xf32, #tpu.memory_space<smem>>
    %32 = vector.broadcast %31 : f32 to vector<1x1x128xf32>
    %c15 = arith.constant 15 : index
    %33 = memref.load %arg2[%c15] : memref<24xf32, #tpu.memory_space<smem>>
    %34 = vector.broadcast %33 : f32 to vector<1x1x128xf32>
    %35 = tpu.concatenate %28, %30, %32, %34 in 0 : vector<1x1x128xf32>, vector<1x1x128xf32>, vector<1x1x128xf32>, vector<1x1x128xf32> -> vector<4x1x128xf32>
    %c16 = arith.constant 16 : index
    %36 = memref.load %arg2[%c16] : memref<24xf32, #tpu.memory_space<smem>>
    %37 = vector.broadcast %36 : f32 to vector<1x1x128xf32>
    %c17 = arith.constant 17 : index
    %38 = memref.load %arg2[%c17] : memref<24xf32, #tpu.memory_space<smem>>
    %39 = vector.broadcast %38 : f32 to vector<1x1x128xf32>
    %c18 = arith.constant 18 : index
    %40 = memref.load %arg2[%c18] : memref<24xf32, #tpu.memory_space<smem>>
    %41 = vector.broadcast %40 : f32 to vector<1x1x128xf32>
    %c19 = arith.constant 19 : index
    %42 = memref.load %arg2[%c19] : memref<24xf32, #tpu.memory_space<smem>>
    %43 = vector.broadcast %42 : f32 to vector<1x1x128xf32>
    %44 = tpu.concatenate %37, %39, %41, %43 in 0 : vector<1x1x128xf32>, vector<1x1x128xf32>, vector<1x1x128xf32>, vector<1x1x128xf32> -> vector<4x1x128xf32>
    %c20 = arith.constant 20 : index
    %45 = memref.load %arg2[%c20] : memref<24xf32, #tpu.memory_space<smem>>
    %46 = vector.broadcast %45 : f32 to vector<1x1x128xf32>
    %c21 = arith.constant 21 : index
    %47 = memref.load %arg2[%c21] : memref<24xf32, #tpu.memory_space<smem>>
    %48 = vector.broadcast %47 : f32 to vector<1x1x128xf32>
    %c22 = arith.constant 22 : index
    %49 = memref.load %arg2[%c22] : memref<24xf32, #tpu.memory_space<smem>>
    %50 = vector.broadcast %49 : f32 to vector<1x1x128xf32>
    %c23 = arith.constant 23 : index
    %51 = memref.load %arg2[%c23] : memref<24xf32, #tpu.memory_space<smem>>
    %52 = vector.broadcast %51 : f32 to vector<1x1x128xf32>
    %53 = tpu.concatenate %46, %48, %50, %52 in 0 : vector<1x1x128xf32>, vector<1x1x128xf32>, vector<1x1x128xf32>, vector<1x1x128xf32> -> vector<4x1x128xf32>
    %c0_i32 = arith.constant 0 : i32
    %54 = arith.cmpi eq, %arg1, %c0_i32 : i32
    %55 = arith.extui %54 : i1 to i32
    %c0_i32_0 = arith.constant 0 : i32
    %56 = arith.cmpi ne, %55, %c0_i32_0 : i32
    scf.if %56 {
      %cst_203 = arith.constant 0.000000e+00 : f32
      %755 = vector.broadcast %cst_203 : f32 to vector<4x1x128xf32>
      %c0_204 = arith.constant 0 : index
      %c0_205 = arith.constant 0 : index
      %c0_206 = arith.constant 0 : index
      %756 = vector.load %arg6[%c0_204, %c0_205, %c0_206] : memref<4x1x128xf32, #tpu.memory_space<vmem>>, vector<4x1x128xf32>
      tpu.vector_store %arg6[%c0_204, %c0_205, %c0_206], %755 {strides = array<i32>} : memref<4x1x128xf32, #tpu.memory_space<vmem>>, vector<4x1x128xf32>,
    } else {
    }
    %c0_1 = arith.constant 0 : index
    %c0_2 = arith.constant 0 : index
    %c0_3 = arith.constant 0 : index
    %57 = vector.load %arg6[%c0_1, %c0_2, %c0_3] : memref<4x1x128xf32, #tpu.memory_space<vmem>>, vector<1x1x128xf32>
    %58 = vector.shape_cast %57 : vector<1x1x128xf32> to vector<1x128xf32>
    %c1_4 = arith.constant 1 : index
    %c0_5 = arith.constant 0 : index
    %c0_6 = arith.constant 0 : index
    %59 = vector.load %arg6[%c1_4, %c0_5, %c0_6] : memref<4x1x128xf32, #tpu.memory_space<vmem>>, vector<1x1x128xf32>
    %60 = vector.shape_cast %59 : vector<1x1x128xf32> to vector<1x128xf32>
    %c2_7 = arith.constant 2 : index
    %c0_8 = arith.constant 0 : index
    %c0_9 = arith.constant 0 : index
    %61 = vector.load %arg6[%c2_7, %c0_8, %c0_9] : memref<4x1x128xf32, #tpu.memory_space<vmem>>, vector<1x1x128xf32>
    %62 = vector.shape_cast %61 : vector<1x1x128xf32> to vector<1x128xf32>
    %c3_10 = arith.constant 3 : index
    %c0_11 = arith.constant 0 : index
    %c0_12 = arith.constant 0 : index
    %63 = vector.load %arg6[%c3_10, %c0_11, %c0_12] : memref<4x1x128xf32, #tpu.memory_space<vmem>>, vector<1x1x128xf32>
    %64 = vector.shape_cast %63 : vector<1x1x128xf32> to vector<1x128xf32>
    %c0_13 = arith.constant 0 : index
    %c0_14 = arith.constant 0 : index
    %c0_15 = arith.constant 0 : index
    %c0_16 = arith.constant 0 : index
    %65 = vector.load %arg3[%c0_13, %c0_14, %c0_15, %c0_16] : memref<8x1x1x128xf32, #tpu.memory_space<vmem>>, vector<1x1x1x128xf32>
    %66 = vector.shape_cast %65 : vector<1x1x1x128xf32> to vector<1x128xf32>
    %67 = vector.shape_cast %66 : vector<1x128xf32> to vector<1x1x128xf32>
    %68 = vector.broadcast %67 : vector<1x1x128xf32> to vector<4x1x128xf32>
    %69 = arith.mulf %8, %68 : vector<4x1x128xf32>
    %70 = vector.shape_cast %58 : vector<1x128xf32> to vector<1x1x128xf32>
    %71 = vector.broadcast %70 : vector<1x1x128xf32> to vector<4x1x128xf32>
    %72 = arith.mulf %17, %71 : vector<4x1x128xf32>
    %73 = arith.addf %69, %72 : vector<4x1x128xf32>
    %74 = arith.addf %73, %26 : vector<4x1x128xf32>
    %75 = math.tanh %74 : vector<4x1x128xf32>
    %76 = vector.extract_strided_slice %75 {offsets = [0, 0, 0], sizes = [1, 1, 128], strides = [1, 1, 1]} : vector<4x1x128xf32> to vector<1x1x128xf32>
    %77 = vector.shape_cast %76 : vector<1x1x128xf32> to vector<1x128xf32>
    %cst = arith.constant 1.000000e+00 : f32
    %78 = vector.broadcast %cst : f32 to vector<1x128xf32>
    %79 = arith.addf %77, %78 : vector<1x128xf32>
    %cst_17 = arith.constant 5.000000e-01 : f32
    %80 = vector.broadcast %cst_17 : f32 to vector<1x128xf32>
    %81 = arith.mulf %80, %79 : vector<1x128xf32>
    %82 = vector.extract_strided_slice %75 {offsets = [1, 0, 0], sizes = [1, 1, 128], strides = [1, 1, 1]} : vector<4x1x128xf32> to vector<1x1x128xf32>
    %83 = vector.shape_cast %82 : vector<1x1x128xf32> to vector<1x128xf32>
    %cst_18 = arith.constant 1.000000e+00 : f32
    %84 = vector.broadcast %cst_18 : f32 to vector<1x128xf32>
    %85 = arith.addf %83, %84 : vector<1x128xf32>
    %cst_19 = arith.constant 5.000000e-01 : f32
    %86 = vector.broadcast %cst_19 : f32 to vector<1x128xf32>
    %87 = arith.mulf %86, %85 : vector<1x128xf32>
    %88 = vector.extract_strided_slice %75 {offsets = [2, 0, 0], sizes = [1, 1, 128], strides = [1, 1, 1]} : vector<4x1x128xf32> to vector<1x1x128xf32>
    %89 = vector.shape_cast %88 : vector<1x1x128xf32> to vector<1x128xf32>
    %90 = vector.extract_strided_slice %75 {offsets = [3, 0, 0], sizes = [1, 1, 128], strides = [1, 1, 1]} : vector<4x1x128xf32> to vector<1x1x128xf32>
    %91 = vector.shape_cast %90 : vector<1x1x128xf32> to vector<1x128xf32>
    %cst_20 = arith.constant 1.000000e+00 : f32
    %92 = vector.broadcast %cst_20 : f32 to vector<1x128xf32>
    %93 = arith.addf %91, %92 : vector<1x128xf32>
    %cst_21 = arith.constant 5.000000e-01 : f32
    %94 = vector.broadcast %cst_21 : f32 to vector<1x128xf32>
    %95 = arith.mulf %94, %93 : vector<1x128xf32>
    %96 = arith.mulf %87, %60 : vector<1x128xf32>
    %97 = arith.mulf %81, %89 : vector<1x128xf32>
    %98 = arith.addf %96, %97 : vector<1x128xf32>
    %99 = math.tanh %98 : vector<1x128xf32>
    %100 = arith.mulf %95, %99 : vector<1x128xf32>
    %c0_i32_22 = arith.constant 0 : i32
    %101 = arith.index_cast %c0_i32_22 : i32 to index
    %c0_23 = arith.constant 0 : index
    %c0_24 = arith.constant 0 : index
    %c0_25 = arith.constant 0 : index
    %102 = vector.load %arg4[%101, %c0_23, %c0_24, %c0_25] : memref<8x1x1x128xf32, #tpu.memory_space<vmem>>, vector<1x1x1x128xf32>
    %103 = vector.shape_cast %102 : vector<1x1x1x128xf32> to vector<1x128xf32>
    %104 = arith.mulf %100, %103 : vector<1x128xf32>
    %c1_i32 = arith.constant 1 : i32
    %105 = arith.addi %c0_i32_22, %c1_i32 : i32
    %106 = arith.index_cast %105 : i32 to index
    %c0_26 = arith.constant 0 : index
    %c0_27 = arith.constant 0 : index
    %c0_28 = arith.constant 0 : index
    %107 = vector.load %arg3[%106, %c0_26, %c0_27, %c0_28] : memref<8x1x1x128xf32, #tpu.memory_space<vmem>>, vector<1x1x1x128xf32>
    %108 = vector.shape_cast %107 : vector<1x1x1x128xf32> to vector<1x128xf32>
    %109 = vector.shape_cast %108 : vector<1x128xf32> to vector<1x1x128xf32>
    %110 = vector.broadcast %109 : vector<1x1x128xf32> to vector<4x1x128xf32>
    %111 = arith.mulf %8, %110 : vector<4x1x128xf32>
    %112 = vector.shape_cast %100 : vector<1x128xf32> to vector<1x1x128xf32>
    %113 = vector.broadcast %112 : vector<1x1x128xf32> to vector<4x1x128xf32>
    %114 = arith.mulf %17, %113 : vector<4x1x128xf32>
    %115 = arith.addf %111, %114 : vector<4x1x128xf32>
    %116 = arith.addf %115, %26 : vector<4x1x128xf32>
    %117 = vector.shape_cast %104 : vector<1x128xf32> to vector<1x1x128xf32>
    %118 = vector.broadcast %117 : vector<1x1x128xf32> to vector<4x1x128xf32>
    %119 = arith.mulf %35, %118 : vector<4x1x128xf32>
    %120 = vector.shape_cast %62 : vector<1x128xf32> to vector<1x1x128xf32>
    %121 = vector.broadcast %120 : vector<1x1x128xf32> to vector<4x1x128xf32>
    %122 = arith.mulf %44, %121 : vector<4x1x128xf32>
    %123 = arith.addf %119, %122 : vector<4x1x128xf32>
    %124 = arith.addf %123, %53 : vector<4x1x128xf32>
    %125 = tpu.concatenate %116, %124 in 0 : vector<4x1x128xf32>, vector<4x1x128xf32> -> vector<8x1x128xf32>
    %126 = math.tanh %125 : vector<8x1x128xf32>
    %127 = vector.extract_strided_slice %126 {offsets = [0, 0, 0], sizes = [1, 1, 128], strides = [1, 1, 1]} : vector<8x1x128xf32> to vector<1x1x128xf32>
    %128 = vector.shape_cast %127 : vector<1x1x128xf32> to vector<1x128xf32>
    %cst_29 = arith.constant 1.000000e+00 : f32
    %129 = vector.broadcast %cst_29 : f32 to vector<1x128xf32>
    %130 = arith.addf %128, %129 : vector<1x128xf32>
    %cst_30 = arith.constant 5.000000e-01 : f32
    %131 = vector.broadcast %cst_30 : f32 to vector<1x128xf32>
    %132 = arith.mulf %131, %130 : vector<1x128xf32>
    %133 = vector.extract_strided_slice %126 {offsets = [1, 0, 0], sizes = [1, 1, 128], strides = [1, 1, 1]} : vector<8x1x128xf32> to vector<1x1x128xf32>
    %134 = vector.shape_cast %133 : vector<1x1x128xf32> to vector<1x128xf32>
    %cst_31 = arith.constant 1.000000e+00 : f32
    %135 = vector.broadcast %cst_31 : f32 to vector<1x128xf32>
    %136 = arith.addf %134, %135 : vector<1x128xf32>
    %cst_32 = arith.constant 5.000000e-01 : f32
    %137 = vector.broadcast %cst_32 : f32 to vector<1x128xf32>
    %138 = arith.mulf %137, %136 : vector<1x128xf32>
    %139 = vector.extract_strided_slice %126 {offsets = [2, 0, 0], sizes = [1, 1, 128], strides = [1, 1, 1]} : vector<8x1x128xf32> to vector<1x1x128xf32>
    %140 = vector.shape_cast %139 : vector<1x1x128xf32> to vector<1x128xf32>
    %141 = vector.extract_strided_slice %126 {offsets = [3, 0, 0], sizes = [1, 1, 128], strides = [1, 1, 1]} : vector<8x1x128xf32> to vector<1x1x128xf32>
    %142 = vector.shape_cast %141 : vector<1x1x128xf32> to vector<1x128xf32>
    %cst_33 = arith.constant 1.000000e+00 : f32
    %143 = vector.broadcast %cst_33 : f32 to vector<1x128xf32>
    %144 = arith.addf %142, %143 : vector<1x128xf32>
    %cst_34 = arith.constant 5.000000e-01 : f32
    %145 = vector.broadcast %cst_34 : f32 to vector<1x128xf32>
    %146 = arith.mulf %145, %144 : vector<1x128xf32>
    %147 = vector.extract_strided_slice %126 {offsets = [4, 0, 0], sizes = [1, 1, 128], strides = [1, 1, 1]} : vector<8x1x128xf32> to vector<1x1x128xf32>
    %148 = vector.shape_cast %147 : vector<1x1x128xf32> to vector<1x128xf32>
    %cst_35 = arith.constant 1.000000e+00 : f32
    %149 = vector.broadcast %cst_35 : f32 to vector<1x128xf32>
    %150 = arith.addf %148, %149 : vector<1x128xf32>
    %cst_36 = arith.constant 5.000000e-01 : f32
    %151 = vector.broadcast %cst_36 : f32 to vector<1x128xf32>
    %152 = arith.mulf %151, %150 : vector<1x128xf32>
    %153 = vector.extract_strided_slice %126 {offsets = [5, 0, 0], sizes = [1, 1, 128], strides = [1, 1, 1]} : vector<8x1x128xf32> to vector<1x1x128xf32>
    %154 = vector.shape_cast %153 : vector<1x1x128xf32> to vector<1x128xf32>
    %cst_37 = arith.constant 1.000000e+00 : f32
    %155 = vector.broadcast %cst_37 : f32 to vector<1x128xf32>
    %156 = arith.addf %154, %155 : vector<1x128xf32>
    %cst_38 = arith.constant 5.000000e-01 : f32
    %157 = vector.broadcast %cst_38 : f32 to vector<1x128xf32>
    %158 = arith.mulf %157, %156 : vector<1x128xf32>
    %159 = vector.extract_strided_slice %126 {offsets = [6, 0, 0], sizes = [1, 1, 128], strides = [1, 1, 1]} : vector<8x1x128xf32> to vector<1x1x128xf32>
    %160 = vector.shape_cast %159 : vector<1x1x128xf32> to vector<1x128xf32>
    %161 = vector.extract_strided_slice %126 {offsets = [7, 0, 0], sizes = [1, 1, 128], strides = [1, 1, 1]} : vector<8x1x128xf32> to vector<1x1x128xf32>
    %162 = vector.shape_cast %161 : vector<1x1x128xf32> to vector<1x128xf32>
    %cst_39 = arith.constant 1.000000e+00 : f32
    %163 = vector.broadcast %cst_39 : f32 to vector<1x128xf32>
    %164 = arith.addf %162, %163 : vector<1x128xf32>
    %cst_40 = arith.constant 5.000000e-01 : f32
    %165 = vector.broadcast %cst_40 : f32 to vector<1x128xf32>
    %166 = arith.mulf %165, %164 : vector<1x128xf32>
    %167 = arith.mulf %138, %98 : vector<1x128xf32>
    %168 = arith.mulf %132, %140 : vector<1x128xf32>
    %169 = arith.addf %167, %168 : vector<1x128xf32>
    %170 = arith.mulf %158, %64 : vector<1x128xf32>
    %171 = arith.mulf %152, %160 : vector<1x128xf32>
    %172 = arith.addf %170, %171 : vector<1x128xf32>
    %173 = vector.shape_cast %169 : vector<1x128xf32> to vector<1x1x128xf32>
    %174 = vector.shape_cast %172 : vector<1x128xf32> to vector<1x1x128xf32>
    %175 = tpu.concatenate %173, %174 in 0 : vector<1x1x128xf32>, vector<1x1x128xf32> -> vector<2x1x128xf32>
    %176 = math.tanh %175 : vector<2x1x128xf32>
    %177 = vector.extract_strided_slice %176 {offsets = [0, 0, 0], sizes = [1, 1, 128], strides = [1, 1, 1]} : vector<2x1x128xf32> to vector<1x1x128xf32>
    %178 = vector.shape_cast %177 : vector<1x1x128xf32> to vector<1x128xf32>
    %179 = arith.mulf %146, %178 : vector<1x128xf32>
    %180 = vector.extract_strided_slice %176 {offsets = [1, 0, 0], sizes = [1, 1, 128], strides = [1, 1, 1]} : vector<2x1x128xf32> to vector<1x1x128xf32>
    %181 = vector.shape_cast %180 : vector<1x1x128xf32> to vector<1x128xf32>
    %182 = arith.mulf %166, %181 : vector<1x128xf32>
    %183 = arith.index_cast %c0_i32_22 : i32 to index
    %c0_41 = arith.constant 0 : index
    %c0_42 = arith.constant 0 : index
    %c0_43 = arith.constant 0 : index
    %184 = vector.load %arg5[%183, %c0_41, %c0_42, %c0_43] : memref<8x1x1x128xf32, #tpu.memory_space<vmem>>, vector<1x1x1x128xf32>
    %185 = vector.shape_cast %184 : vector<1x1x1x128xf32> to vector<1x128xf32>
    %186 = vector.shape_cast %182 : vector<1x128xf32> to vector<1x1x1x128xf32>
    tpu.vector_store %arg5[%183, %c0_41, %c0_42, %c0_43], %186 {strides = array<i32>} : memref<8x1x1x128xf32, #tpu.memory_space<vmem>>, vector<1x1x1x128xf32>,
    %c1_i32_44 = arith.constant 1 : i32
    %187 = arith.index_cast %c1_i32_44 : i32 to index
    %c0_45 = arith.constant 0 : index
    %c0_46 = arith.constant 0 : index
    %c0_47 = arith.constant 0 : index
    %188 = vector.load %arg4[%187, %c0_45, %c0_46, %c0_47] : memref<8x1x1x128xf32, #tpu.memory_space<vmem>>, vector<1x1x1x128xf32>
    %189 = vector.shape_cast %188 : vector<1x1x1x128xf32> to vector<1x128xf32>
    %190 = arith.mulf %179, %189 : vector<1x128xf32>
    %c1_i32_48 = arith.constant 1 : i32
    %191 = arith.addi %c1_i32_44, %c1_i32_48 : i32
    %192 = arith.index_cast %191 : i32 to index
    %c0_49 = arith.constant 0 : index
    %c0_50 = arith.constant 0 : index
    %c0_51 = arith.constant 0 : index
    %193 = vector.load %arg3[%192, %c0_49, %c0_50, %c0_51] : memref<8x1x1x128xf32, #tpu.memory_space<vmem>>, vector<1x1x1x128xf32>
    %194 = vector.shape_cast %193 : vector<1x1x1x128xf32> to vector<1x128xf32>
    %195 = vector.shape_cast %194 : vector<1x128xf32> to vector<1x1x128xf32>
    %196 = vector.broadcast %195 : vector<1x1x128xf32> to vector<4x1x128xf32>
    %197 = arith.mulf %8, %196 : vector<4x1x128xf32>
    %198 = vector.shape_cast %179 : vector<1x128xf32> to vector<1x1x128xf32>
    %199 = vector.broadcast %198 : vector<1x1x128xf32> to vector<4x1x128xf32>
    %200 = arith.mulf %17, %199 : vector<4x1x128xf32>
    %201 = arith.addf %197, %200 : vector<4x1x128xf32>
    %202 = arith.addf %201, %26 : vector<4x1x128xf32>
    %203 = vector.shape_cast %190 : vector<1x128xf32> to vector<1x1x128xf32>
    %204 = vector.broadcast %203 : vector<1x1x128xf32> to vector<4x1x128xf32>
    %205 = arith.mulf %35, %204 : vector<4x1x128xf32>
    %206 = vector.shape_cast %182 : vector<1x128xf32> to vector<1x1x128xf32>
    %207 = vector.broadcast %206 : vector<1x1x128xf32> to vector<4x1x128xf32>
    %208 = arith.mulf %44, %207 : vector<4x1x128xf32>
    %209 = arith.addf %205, %208 : vector<4x1x128xf32>
    %210 = arith.addf %209, %53 : vector<4x1x128xf32>
    %211 = tpu.concatenate %202, %210 in 0 : vector<4x1x128xf32>, vector<4x1x128xf32> -> vector<8x1x128xf32>
    %212 = math.tanh %211 : vector<8x1x128xf32>
    %213 = vector.extract_strided_slice %212 {offsets = [0, 0, 0], sizes = [1, 1, 128], strides = [1, 1, 1]} : vector<8x1x128xf32> to vector<1x1x128xf32>
    %214 = vector.shape_cast %213 : vector<1x1x128xf32> to vector<1x128xf32>
    %cst_52 = arith.constant 1.000000e+00 : f32
    %215 = vector.broadcast %cst_52 : f32 to vector<1x128xf32>
    %216 = arith.addf %214, %215 : vector<1x128xf32>
    %cst_53 = arith.constant 5.000000e-01 : f32
    %217 = vector.broadcast %cst_53 : f32 to vector<1x128xf32>
    %218 = arith.mulf %217, %216 : vector<1x128xf32>
    %219 = vector.extract_strided_slice %212 {offsets = [1, 0, 0], sizes = [1, 1, 128], strides = [1, 1, 1]} : vector<8x1x128xf32> to vector<1x1x128xf32>
    %220 = vector.shape_cast %219 : vector<1x1x128xf32> to vector<1x128xf32>
    %cst_54 = arith.constant 1.000000e+00 : f32
    %221 = vector.broadcast %cst_54 : f32 to vector<1x128xf32>
    %222 = arith.addf %220, %221 : vector<1x128xf32>
    %cst_55 = arith.constant 5.000000e-01 : f32
    %223 = vector.broadcast %cst_55 : f32 to vector<1x128xf32>
    %224 = arith.mulf %223, %222 : vector<1x128xf32>
    %225 = vector.extract_strided_slice %212 {offsets = [2, 0, 0], sizes = [1, 1, 128], strides = [1, 1, 1]} : vector<8x1x128xf32> to vector<1x1x128xf32>
    %226 = vector.shape_cast %225 : vector<1x1x128xf32> to vector<1x128xf32>
    %227 = vector.extract_strided_slice %212 {offsets = [3, 0, 0], sizes = [1, 1, 128], strides = [1, 1, 1]} : vector<8x1x128xf32> to vector<1x1x128xf32>
    %228 = vector.shape_cast %227 : vector<1x1x128xf32> to vector<1x128xf32>
    %cst_56 = arith.constant 1.000000e+00 : f32
    %229 = vector.broadcast %cst_56 : f32 to vector<1x128xf32>
    %230 = arith.addf %228, %229 : vector<1x128xf32>
    %cst_57 = arith.constant 5.000000e-01 : f32
    %231 = vector.broadcast %cst_57 : f32 to vector<1x128xf32>
    %232 = arith.mulf %231, %230 : vector<1x128xf32>
    %233 = vector.extract_strided_slice %212 {offsets = [4, 0, 0], sizes = [1, 1, 128], strides = [1, 1, 1]} : vector<8x1x128xf32> to vector<1x1x128xf32>
    %234 = vector.shape_cast %233 : vector<1x1x128xf32> to vector<1x128xf32>
    %cst_58 = arith.constant 1.000000e+00 : f32
    %235 = vector.broadcast %cst_58 : f32 to vector<1x128xf32>
    %236 = arith.addf %234, %235 : vector<1x128xf32>
    %cst_59 = arith.constant 5.000000e-01 : f32
    %237 = vector.broadcast %cst_59 : f32 to vector<1x128xf32>
    %238 = arith.mulf %237, %236 : vector<1x128xf32>
    %239 = vector.extract_strided_slice %212 {offsets = [5, 0, 0], sizes = [1, 1, 128], strides = [1, 1, 1]} : vector<8x1x128xf32> to vector<1x1x128xf32>
    %240 = vector.shape_cast %239 : vector<1x1x128xf32> to vector<1x128xf32>
    %cst_60 = arith.constant 1.000000e+00 : f32
    %241 = vector.broadcast %cst_60 : f32 to vector<1x128xf32>
    %242 = arith.addf %240, %241 : vector<1x128xf32>
    %cst_61 = arith.constant 5.000000e-01 : f32
    %243 = vector.broadcast %cst_61 : f32 to vector<1x128xf32>
    %244 = arith.mulf %243, %242 : vector<1x128xf32>
    %245 = vector.extract_strided_slice %212 {offsets = [6, 0, 0], sizes = [1, 1, 128], strides = [1, 1, 1]} : vector<8x1x128xf32> to vector<1x1x128xf32>
    %246 = vector.shape_cast %245 : vector<1x1x128xf32> to vector<1x128xf32>
    %247 = vector.extract_strided_slice %212 {offsets = [7, 0, 0], sizes = [1, 1, 128], strides = [1, 1, 1]} : vector<8x1x128xf32> to vector<1x1x128xf32>
    %248 = vector.shape_cast %247 : vector<1x1x128xf32> to vector<1x128xf32>
    %cst_62 = arith.constant 1.000000e+00 : f32
    %249 = vector.broadcast %cst_62 : f32 to vector<1x128xf32>
    %250 = arith.addf %248, %249 : vector<1x128xf32>
    %cst_63 = arith.constant 5.000000e-01 : f32
    %251 = vector.broadcast %cst_63 : f32 to vector<1x128xf32>
    %252 = arith.mulf %251, %250 : vector<1x128xf32>
    %253 = arith.mulf %224, %169 : vector<1x128xf32>
    %254 = arith.mulf %218, %226 : vector<1x128xf32>
    %255 = arith.addf %253, %254 : vector<1x128xf32>
    %256 = arith.mulf %244, %172 : vector<1x128xf32>
    %257 = arith.mulf %238, %246 : vector<1x128xf32>
    %258 = arith.addf %256, %257 : vector<1x128xf32>
    %259 = vector.shape_cast %255 : vector<1x128xf32> to vector<1x1x128xf32>
    %260 = vector.shape_cast %258 : vector<1x128xf32> to vector<1x1x128xf32>
    %261 = tpu.concatenate %259, %260 in 0 : vector<1x1x128xf32>, vector<1x1x128xf32> -> vector<2x1x128xf32>
    %262 = math.tanh %261 : vector<2x1x128xf32>
    %263 = vector.extract_strided_slice %262 {offsets = [0, 0, 0], sizes = [1, 1, 128], strides = [1, 1, 1]} : vector<2x1x128xf32> to vector<1x1x128xf32>
    %264 = vector.shape_cast %263 : vector<1x1x128xf32> to vector<1x128xf32>
    %265 = arith.mulf %232, %264 : vector<1x128xf32>
    %266 = vector.extract_strided_slice %262 {offsets = [1, 0, 0], sizes = [1, 1, 128], strides = [1, 1, 1]} : vector<2x1x128xf32> to vector<1x1x128xf32>
    %267 = vector.shape_cast %266 : vector<1x1x128xf32> to vector<1x128xf32>
    %268 = arith.mulf %252, %267 : vector<1x128xf32>
    %269 = arith.index_cast %c1_i32_44 : i32 to index
    %c0_64 = arith.constant 0 : index
    %c0_65 = arith.constant 0 : index
    %c0_66 = arith.constant 0 : index
    %270 = vector.load %arg5[%269, %c0_64, %c0_65, %c0_66] : memref<8x1x1x128xf32, #tpu.memory_space<vmem>>, vector<1x1x1x128xf32>
    %271 = vector.shape_cast %270 : vector<1x1x1x128xf32> to vector<1x128xf32>
    %272 = vector.shape_cast %268 : vector<1x128xf32> to vector<1x1x1x128xf32>
    tpu.vector_store %arg5[%269, %c0_64, %c0_65, %c0_66], %272 {strides = array<i32>} : memref<8x1x1x128xf32, #tpu.memory_space<vmem>>, vector<1x1x1x128xf32>,
    %c2_i32 = arith.constant 2 : i32
    %273 = arith.index_cast %c2_i32 : i32 to index
    %c0_67 = arith.constant 0 : index
    %c0_68 = arith.constant 0 : index
    %c0_69 = arith.constant 0 : index
    %274 = vector.load %arg4[%273, %c0_67, %c0_68, %c0_69] : memref<8x1x1x128xf32, #tpu.memory_space<vmem>>, vector<1x1x1x128xf32>
    %275 = vector.shape_cast %274 : vector<1x1x1x128xf32> to vector<1x128xf32>
    %276 = arith.mulf %265, %275 : vector<1x128xf32>
    %c1_i32_70 = arith.constant 1 : i32
    %277 = arith.addi %c2_i32, %c1_i32_70 : i32
    %278 = arith.index_cast %277 : i32 to index
    %c0_71 = arith.constant 0 : index
    %c0_72 = arith.constant 0 : index
    %c0_73 = arith.constant 0 : index
    %279 = vector.load %arg3[%278, %c0_71, %c0_72, %c0_73] : memref<8x1x1x128xf32, #tpu.memory_space<vmem>>, vector<1x1x1x128xf32>
    %280 = vector.shape_cast %279 : vector<1x1x1x128xf32> to vector<1x128xf32>
    %281 = vector.shape_cast %280 : vector<1x128xf32> to vector<1x1x128xf32>
    %282 = vector.broadcast %281 : vector<1x1x128xf32> to vector<4x1x128xf32>
    %283 = arith.mulf %8, %282 : vector<4x1x128xf32>
    %284 = vector.shape_cast %265 : vector<1x128xf32> to vector<1x1x128xf32>
    %285 = vector.broadcast %284 : vector<1x1x128xf32> to vector<4x1x128xf32>
    %286 = arith.mulf %17, %285 : vector<4x1x128xf32>
    %287 = arith.addf %283, %286 : vector<4x1x128xf32>
    %288 = arith.addf %287, %26 : vector<4x1x128xf32>
    %289 = vector.shape_cast %276 : vector<1x128xf32> to vector<1x1x128xf32>
    %290 = vector.broadcast %289 : vector<1x1x128xf32> to vector<4x1x128xf32>
    %291 = arith.mulf %35, %290 : vector<4x1x128xf32>
    %292 = vector.shape_cast %268 : vector<1x128xf32> to vector<1x1x128xf32>
    %293 = vector.broadcast %292 : vector<1x1x128xf32> to vector<4x1x128xf32>
    %294 = arith.mulf %44, %293 : vector<4x1x128xf32>
    %295 = arith.addf %291, %294 : vector<4x1x128xf32>
    %296 = arith.addf %295, %53 : vector<4x1x128xf32>
    %297 = tpu.concatenate %288, %296 in 0 : vector<4x1x128xf32>, vector<4x1x128xf32> -> vector<8x1x128xf32>
    %298 = math.tanh %297 : vector<8x1x128xf32>
    %299 = vector.extract_strided_slice %298 {offsets = [0, 0, 0], sizes = [1, 1, 128], strides = [1, 1, 1]} : vector<8x1x128xf32> to vector<1x1x128xf32>
    %300 = vector.shape_cast %299 : vector<1x1x128xf32> to vector<1x128xf32>
    %cst_74 = arith.constant 1.000000e+00 : f32
    %301 = vector.broadcast %cst_74 : f32 to vector<1x128xf32>
    %302 = arith.addf %300, %301 : vector<1x128xf32>
    %cst_75 = arith.constant 5.000000e-01 : f32
    %303 = vector.broadcast %cst_75 : f32 to vector<1x128xf32>
    %304 = arith.mulf %303, %302 : vector<1x128xf32>
    %305 = vector.extract_strided_slice %298 {offsets = [1, 0, 0], sizes = [1, 1, 128], strides = [1, 1, 1]} : vector<8x1x128xf32> to vector<1x1x128xf32>
    %306 = vector.shape_cast %305 : vector<1x1x128xf32> to vector<1x128xf32>
    %cst_76 = arith.constant 1.000000e+00 : f32
    %307 = vector.broadcast %cst_76 : f32 to vector<1x128xf32>
    %308 = arith.addf %306, %307 : vector<1x128xf32>
    %cst_77 = arith.constant 5.000000e-01 : f32
    %309 = vector.broadcast %cst_77 : f32 to vector<1x128xf32>
    %310 = arith.mulf %309, %308 : vector<1x128xf32>
    %311 = vector.extract_strided_slice %298 {offsets = [2, 0, 0], sizes = [1, 1, 128], strides = [1, 1, 1]} : vector<8x1x128xf32> to vector<1x1x128xf32>
    %312 = vector.shape_cast %311 : vector<1x1x128xf32> to vector<1x128xf32>
    %313 = vector.extract_strided_slice %298 {offsets = [3, 0, 0], sizes = [1, 1, 128], strides = [1, 1, 1]} : vector<8x1x128xf32> to vector<1x1x128xf32>
    %314 = vector.shape_cast %313 : vector<1x1x128xf32> to vector<1x128xf32>
    %cst_78 = arith.constant 1.000000e+00 : f32
    %315 = vector.broadcast %cst_78 : f32 to vector<1x128xf32>
    %316 = arith.addf %314, %315 : vector<1x128xf32>
    %cst_79 = arith.constant 5.000000e-01 : f32
    %317 = vector.broadcast %cst_79 : f32 to vector<1x128xf32>
    %318 = arith.mulf %317, %316 : vector<1x128xf32>
    %319 = vector.extract_strided_slice %298 {offsets = [4, 0, 0], sizes = [1, 1, 128], strides = [1, 1, 1]} : vector<8x1x128xf32> to vector<1x1x128xf32>
    %320 = vector.shape_cast %319 : vector<1x1x128xf32> to vector<1x128xf32>
    %cst_80 = arith.constant 1.000000e+00 : f32
    %321 = vector.broadcast %cst_80 : f32 to vector<1x128xf32>
    %322 = arith.addf %320, %321 : vector<1x128xf32>
    %cst_81 = arith.constant 5.000000e-01 : f32
    %323 = vector.broadcast %cst_81 : f32 to vector<1x128xf32>
    %324 = arith.mulf %323, %322 : vector<1x128xf32>
    %325 = vector.extract_strided_slice %298 {offsets = [5, 0, 0], sizes = [1, 1, 128], strides = [1, 1, 1]} : vector<8x1x128xf32> to vector<1x1x128xf32>
    %326 = vector.shape_cast %325 : vector<1x1x128xf32> to vector<1x128xf32>
    %cst_82 = arith.constant 1.000000e+00 : f32
    %327 = vector.broadcast %cst_82 : f32 to vector<1x128xf32>
    %328 = arith.addf %326, %327 : vector<1x128xf32>
    %cst_83 = arith.constant 5.000000e-01 : f32
    %329 = vector.broadcast %cst_83 : f32 to vector<1x128xf32>
    %330 = arith.mulf %329, %328 : vector<1x128xf32>
    %331 = vector.extract_strided_slice %298 {offsets = [6, 0, 0], sizes = [1, 1, 128], strides = [1, 1, 1]} : vector<8x1x128xf32> to vector<1x1x128xf32>
    %332 = vector.shape_cast %331 : vector<1x1x128xf32> to vector<1x128xf32>
    %333 = vector.extract_strided_slice %298 {offsets = [7, 0, 0], sizes = [1, 1, 128], strides = [1, 1, 1]} : vector<8x1x128xf32> to vector<1x1x128xf32>
    %334 = vector.shape_cast %333 : vector<1x1x128xf32> to vector<1x128xf32>
    %cst_84 = arith.constant 1.000000e+00 : f32
    %335 = vector.broadcast %cst_84 : f32 to vector<1x128xf32>
    %336 = arith.addf %334, %335 : vector<1x128xf32>
    %cst_85 = arith.constant 5.000000e-01 : f32
    %337 = vector.broadcast %cst_85 : f32 to vector<1x128xf32>
    %338 = arith.mulf %337, %336 : vector<1x128xf32>
    %339 = arith.mulf %310, %255 : vector<1x128xf32>
    %340 = arith.mulf %304, %312 : vector<1x128xf32>
    %341 = arith.addf %339, %340 : vector<1x128xf32>
    %342 = arith.mulf %330, %258 : vector<1x128xf32>
    %343 = arith.mulf %324, %332 : vector<1x128xf32>
    %344 = arith.addf %342, %343 : vector<1x128xf32>
    %345 = vector.shape_cast %341 : vector<1x128xf32> to vector<1x1x128xf32>
    %346 = vector.shape_cast %344 : vector<1x128xf32> to vector<1x1x128xf32>
    %347 = tpu.concatenate %345, %346 in 0 : vector<1x1x128xf32>, vector<1x1x128xf32> -> vector<2x1x128xf32>
    %348 = math.tanh %347 : vector<2x1x128xf32>
    %349 = vector.extract_strided_slice %348 {offsets = [0, 0, 0], sizes = [1, 1, 128], strides = [1, 1, 1]} : vector<2x1x128xf32> to vector<1x1x128xf32>
    %350 = vector.shape_cast %349 : vector<1x1x128xf32> to vector<1x128xf32>
    %351 = arith.mulf %318, %350 : vector<1x128xf32>
    %352 = vector.extract_strided_slice %348 {offsets = [1, 0, 0], sizes = [1, 1, 128], strides = [1, 1, 1]} : vector<2x1x128xf32> to vector<1x1x128xf32>
    %353 = vector.shape_cast %352 : vector<1x1x128xf32> to vector<1x128xf32>
    %354 = arith.mulf %338, %353 : vector<1x128xf32>
    %355 = arith.index_cast %c2_i32 : i32 to index
    %c0_86 = arith.constant 0 : index
    %c0_87 = arith.constant 0 : index
    %c0_88 = arith.constant 0 : index
    %356 = vector.load %arg5[%355, %c0_86, %c0_87, %c0_88] : memref<8x1x1x128xf32, #tpu.memory_space<vmem>>, vector<1x1x1x128xf32>
    %357 = vector.shape_cast %356 : vector<1x1x1x128xf32> to vector<1x128xf32>
    %358 = vector.shape_cast %354 : vector<1x128xf32> to vector<1x1x1x128xf32>
    tpu.vector_store %arg5[%355, %c0_86, %c0_87, %c0_88], %358 {strides = array<i32>} : memref<8x1x1x128xf32, #tpu.memory_space<vmem>>, vector<1x1x1x128xf32>,
    %c3_i32 = arith.constant 3 : i32
    %359 = arith.index_cast %c3_i32 : i32 to index
    %c0_89 = arith.constant 0 : index
    %c0_90 = arith.constant 0 : index
    %c0_91 = arith.constant 0 : index
    %360 = vector.load %arg4[%359, %c0_89, %c0_90, %c0_91] : memref<8x1x1x128xf32, #tpu.memory_space<vmem>>, vector<1x1x1x128xf32>
    %361 = vector.shape_cast %360 : vector<1x1x1x128xf32> to vector<1x128xf32>
    %362 = arith.mulf %351, %361 : vector<1x128xf32>
    %c1_i32_92 = arith.constant 1 : i32
    %363 = arith.addi %c3_i32, %c1_i32_92 : i32
    %364 = arith.index_cast %363 : i32 to index
    %c0_93 = arith.constant 0 : index
    %c0_94 = arith.constant 0 : index
    %c0_95 = arith.constant 0 : index
    %365 = vector.load %arg3[%364, %c0_93, %c0_94, %c0_95] : memref<8x1x1x128xf32, #tpu.memory_space<vmem>>, vector<1x1x1x128xf32>
    %366 = vector.shape_cast %365 : vector<1x1x1x128xf32> to vector<1x128xf32>
    %367 = vector.shape_cast %366 : vector<1x128xf32> to vector<1x1x128xf32>
    %368 = vector.broadcast %367 : vector<1x1x128xf32> to vector<4x1x128xf32>
    %369 = arith.mulf %8, %368 : vector<4x1x128xf32>
    %370 = vector.shape_cast %351 : vector<1x128xf32> to vector<1x1x128xf32>
    %371 = vector.broadcast %370 : vector<1x1x128xf32> to vector<4x1x128xf32>
    %372 = arith.mulf %17, %371 : vector<4x1x128xf32>
    %373 = arith.addf %369, %372 : vector<4x1x128xf32>
    %374 = arith.addf %373, %26 : vector<4x1x128xf32>
    %375 = vector.shape_cast %362 : vector<1x128xf32> to vector<1x1x128xf32>
    %376 = vector.broadcast %375 : vector<1x1x128xf32> to vector<4x1x128xf32>
    %377 = arith.mulf %35, %376 : vector<4x1x128xf32>
    %378 = vector.shape_cast %354 : vector<1x128xf32> to vector<1x1x128xf32>
    %379 = vector.broadcast %378 : vector<1x1x128xf32> to vector<4x1x128xf32>
    %380 = arith.mulf %44, %379 : vector<4x1x128xf32>
    %381 = arith.addf %377, %380 : vector<4x1x128xf32>
    %382 = arith.addf %381, %53 : vector<4x1x128xf32>
    %383 = tpu.concatenate %374, %382 in 0 : vector<4x1x128xf32>, vector<4x1x128xf32> -> vector<8x1x128xf32>
    %384 = math.tanh %383 : vector<8x1x128xf32>
    %385 = vector.extract_strided_slice %384 {offsets = [0, 0, 0], sizes = [1, 1, 128], strides = [1, 1, 1]} : vector<8x1x128xf32> to vector<1x1x128xf32>
    %386 = vector.shape_cast %385 : vector<1x1x128xf32> to vector<1x128xf32>
    %cst_96 = arith.constant 1.000000e+00 : f32
    %387 = vector.broadcast %cst_96 : f32 to vector<1x128xf32>
    %388 = arith.addf %386, %387 : vector<1x128xf32>
    %cst_97 = arith.constant 5.000000e-01 : f32
    %389 = vector.broadcast %cst_97 : f32 to vector<1x128xf32>
    %390 = arith.mulf %389, %388 : vector<1x128xf32>
    %391 = vector.extract_strided_slice %384 {offsets = [1, 0, 0], sizes = [1, 1, 128], strides = [1, 1, 1]} : vector<8x1x128xf32> to vector<1x1x128xf32>
    %392 = vector.shape_cast %391 : vector<1x1x128xf32> to vector<1x128xf32>
    %cst_98 = arith.constant 1.000000e+00 : f32
    %393 = vector.broadcast %cst_98 : f32 to vector<1x128xf32>
    %394 = arith.addf %392, %393 : vector<1x128xf32>
    %cst_99 = arith.constant 5.000000e-01 : f32
    %395 = vector.broadcast %cst_99 : f32 to vector<1x128xf32>
    %396 = arith.mulf %395, %394 : vector<1x128xf32>
    %397 = vector.extract_strided_slice %384 {offsets = [2, 0, 0], sizes = [1, 1, 128], strides = [1, 1, 1]} : vector<8x1x128xf32> to vector<1x1x128xf32>
    %398 = vector.shape_cast %397 : vector<1x1x128xf32> to vector<1x128xf32>
    %399 = vector.extract_strided_slice %384 {offsets = [3, 0, 0], sizes = [1, 1, 128], strides = [1, 1, 1]} : vector<8x1x128xf32> to vector<1x1x128xf32>
    %400 = vector.shape_cast %399 : vector<1x1x128xf32> to vector<1x128xf32>
    %cst_100 = arith.constant 1.000000e+00 : f32
    %401 = vector.broadcast %cst_100 : f32 to vector<1x128xf32>
    %402 = arith.addf %400, %401 : vector<1x128xf32>
    %cst_101 = arith.constant 5.000000e-01 : f32
    %403 = vector.broadcast %cst_101 : f32 to vector<1x128xf32>
    %404 = arith.mulf %403, %402 : vector<1x128xf32>
    %405 = vector.extract_strided_slice %384 {offsets = [4, 0, 0], sizes = [1, 1, 128], strides = [1, 1, 1]} : vector<8x1x128xf32> to vector<1x1x128xf32>
    %406 = vector.shape_cast %405 : vector<1x1x128xf32> to vector<1x128xf32>
    %cst_102 = arith.constant 1.000000e+00 : f32
    %407 = vector.broadcast %cst_102 : f32 to vector<1x128xf32>
    %408 = arith.addf %406, %407 : vector<1x128xf32>
    %cst_103 = arith.constant 5.000000e-01 : f32
    %409 = vector.broadcast %cst_103 : f32 to vector<1x128xf32>
    %410 = arith.mulf %409, %408 : vector<1x128xf32>
    %411 = vector.extract_strided_slice %384 {offsets = [5, 0, 0], sizes = [1, 1, 128], strides = [1, 1, 1]} : vector<8x1x128xf32> to vector<1x1x128xf32>
    %412 = vector.shape_cast %411 : vector<1x1x128xf32> to vector<1x128xf32>
    %cst_104 = arith.constant 1.000000e+00 : f32
    %413 = vector.broadcast %cst_104 : f32 to vector<1x128xf32>
    %414 = arith.addf %412, %413 : vector<1x128xf32>
    %cst_105 = arith.constant 5.000000e-01 : f32
    %415 = vector.broadcast %cst_105 : f32 to vector<1x128xf32>
    %416 = arith.mulf %415, %414 : vector<1x128xf32>
    %417 = vector.extract_strided_slice %384 {offsets = [6, 0, 0], sizes = [1, 1, 128], strides = [1, 1, 1]} : vector<8x1x128xf32> to vector<1x1x128xf32>
    %418 = vector.shape_cast %417 : vector<1x1x128xf32> to vector<1x128xf32>
    %419 = vector.extract_strided_slice %384 {offsets = [7, 0, 0], sizes = [1, 1, 128], strides = [1, 1, 1]} : vector<8x1x128xf32> to vector<1x1x128xf32>
    %420 = vector.shape_cast %419 : vector<1x1x128xf32> to vector<1x128xf32>
    %cst_106 = arith.constant 1.000000e+00 : f32
    %421 = vector.broadcast %cst_106 : f32 to vector<1x128xf32>
    %422 = arith.addf %420, %421 : vector<1x128xf32>
    %cst_107 = arith.constant 5.000000e-01 : f32
    %423 = vector.broadcast %cst_107 : f32 to vector<1x128xf32>
    %424 = arith.mulf %423, %422 : vector<1x128xf32>
    %425 = arith.mulf %396, %341 : vector<1x128xf32>
    %426 = arith.mulf %390, %398 : vector<1x128xf32>
    %427 = arith.addf %425, %426 : vector<1x128xf32>
    %428 = arith.mulf %416, %344 : vector<1x128xf32>
    %429 = arith.mulf %410, %418 : vector<1x128xf32>
    %430 = arith.addf %428, %429 : vector<1x128xf32>
    %431 = vector.shape_cast %427 : vector<1x128xf32> to vector<1x1x128xf32>
    %432 = vector.shape_cast %430 : vector<1x128xf32> to vector<1x1x128xf32>
    %433 = tpu.concatenate %431, %432 in 0 : vector<1x1x128xf32>, vector<1x1x128xf32> -> vector<2x1x128xf32>
    %434 = math.tanh %433 : vector<2x1x128xf32>
    %435 = vector.extract_strided_slice %434 {offsets = [0, 0, 0], sizes = [1, 1, 128], strides = [1, 1, 1]} : vector<2x1x128xf32> to vector<1x1x128xf32>
    %436 = vector.shape_cast %435 : vector<1x1x128xf32> to vector<1x128xf32>
    %437 = arith.mulf %404, %436 : vector<1x128xf32>
    %438 = vector.extract_strided_slice %434 {offsets = [1, 0, 0], sizes = [1, 1, 128], strides = [1, 1, 1]} : vector<2x1x128xf32> to vector<1x1x128xf32>
    %439 = vector.shape_cast %438 : vector<1x1x128xf32> to vector<1x128xf32>
    %440 = arith.mulf %424, %439 : vector<1x128xf32>
    %441 = arith.index_cast %c3_i32 : i32 to index
    %c0_108 = arith.constant 0 : index
    %c0_109 = arith.constant 0 : index
    %c0_110 = arith.constant 0 : index
    %442 = vector.load %arg5[%441, %c0_108, %c0_109, %c0_110] : memref<8x1x1x128xf32, #tpu.memory_space<vmem>>, vector<1x1x1x128xf32>
    %443 = vector.shape_cast %442 : vector<1x1x1x128xf32> to vector<1x128xf32>
    %444 = vector.shape_cast %440 : vector<1x128xf32> to vector<1x1x1x128xf32>
    tpu.vector_store %arg5[%441, %c0_108, %c0_109, %c0_110], %444 {strides = array<i32>} : memref<8x1x1x128xf32, #tpu.memory_space<vmem>>, vector<1x1x1x128xf32>,
    %c4_i32 = arith.constant 4 : i32
    %445 = arith.index_cast %c4_i32 : i32 to index
    %c0_111 = arith.constant 0 : index
    %c0_112 = arith.constant 0 : index
    %c0_113 = arith.constant 0 : index
    %446 = vector.load %arg4[%445, %c0_111, %c0_112, %c0_113] : memref<8x1x1x128xf32, #tpu.memory_space<vmem>>, vector<1x1x1x128xf32>
    %447 = vector.shape_cast %446 : vector<1x1x1x128xf32> to vector<1x128xf32>
    %448 = arith.mulf %437, %447 : vector<1x128xf32>
    %c1_i32_114 = arith.constant 1 : i32
    %449 = arith.addi %c4_i32, %c1_i32_114 : i32
    %450 = arith.index_cast %449 : i32 to index
    %c0_115 = arith.constant 0 : index
    %c0_116 = arith.constant 0 : index
    %c0_117 = arith.constant 0 : index
    %451 = vector.load %arg3[%450, %c0_115, %c0_116, %c0_117] : memref<8x1x1x128xf32, #tpu.memory_space<vmem>>, vector<1x1x1x128xf32>
    %452 = vector.shape_cast %451 : vector<1x1x1x128xf32> to vector<1x128xf32>
    %453 = vector.shape_cast %452 : vector<1x128xf32> to vector<1x1x128xf32>
    %454 = vector.broadcast %453 : vector<1x1x128xf32> to vector<4x1x128xf32>
    %455 = arith.mulf %8, %454 : vector<4x1x128xf32>
    %456 = vector.shape_cast %437 : vector<1x128xf32> to vector<1x1x128xf32>
    %457 = vector.broadcast %456 : vector<1x1x128xf32> to vector<4x1x128xf32>
    %458 = arith.mulf %17, %457 : vector<4x1x128xf32>
    %459 = arith.addf %455, %458 : vector<4x1x128xf32>
    %460 = arith.addf %459, %26 : vector<4x1x128xf32>
    %461 = vector.shape_cast %448 : vector<1x128xf32> to vector<1x1x128xf32>
    %462 = vector.broadcast %461 : vector<1x1x128xf32> to vector<4x1x128xf32>
    %463 = arith.mulf %35, %462 : vector<4x1x128xf32>
    %464 = vector.shape_cast %440 : vector<1x128xf32> to vector<1x1x128xf32>
    %465 = vector.broadcast %464 : vector<1x1x128xf32> to vector<4x1x128xf32>
    %466 = arith.mulf %44, %465 : vector<4x1x128xf32>
    %467 = arith.addf %463, %466 : vector<4x1x128xf32>
    %468 = arith.addf %467, %53 : vector<4x1x128xf32>
    %469 = tpu.concatenate %460, %468 in 0 : vector<4x1x128xf32>, vector<4x1x128xf32> -> vector<8x1x128xf32>
    %470 = math.tanh %469 : vector<8x1x128xf32>
    %471 = vector.extract_strided_slice %470 {offsets = [0, 0, 0], sizes = [1, 1, 128], strides = [1, 1, 1]} : vector<8x1x128xf32> to vector<1x1x128xf32>
    %472 = vector.shape_cast %471 : vector<1x1x128xf32> to vector<1x128xf32>
    %cst_118 = arith.constant 1.000000e+00 : f32
    %473 = vector.broadcast %cst_118 : f32 to vector<1x128xf32>
    %474 = arith.addf %472, %473 : vector<1x128xf32>
    %cst_119 = arith.constant 5.000000e-01 : f32
    %475 = vector.broadcast %cst_119 : f32 to vector<1x128xf32>
    %476 = arith.mulf %475, %474 : vector<1x128xf32>
    %477 = vector.extract_strided_slice %470 {offsets = [1, 0, 0], sizes = [1, 1, 128], strides = [1, 1, 1]} : vector<8x1x128xf32> to vector<1x1x128xf32>
    %478 = vector.shape_cast %477 : vector<1x1x128xf32> to vector<1x128xf32>
    %cst_120 = arith.constant 1.000000e+00 : f32
    %479 = vector.broadcast %cst_120 : f32 to vector<1x128xf32>
    %480 = arith.addf %478, %479 : vector<1x128xf32>
    %cst_121 = arith.constant 5.000000e-01 : f32
    %481 = vector.broadcast %cst_121 : f32 to vector<1x128xf32>
    %482 = arith.mulf %481, %480 : vector<1x128xf32>
    %483 = vector.extract_strided_slice %470 {offsets = [2, 0, 0], sizes = [1, 1, 128], strides = [1, 1, 1]} : vector<8x1x128xf32> to vector<1x1x128xf32>
    %484 = vector.shape_cast %483 : vector<1x1x128xf32> to vector<1x128xf32>
    %485 = vector.extract_strided_slice %470 {offsets = [3, 0, 0], sizes = [1, 1, 128], strides = [1, 1, 1]} : vector<8x1x128xf32> to vector<1x1x128xf32>
    %486 = vector.shape_cast %485 : vector<1x1x128xf32> to vector<1x128xf32>
    %cst_122 = arith.constant 1.000000e+00 : f32
    %487 = vector.broadcast %cst_122 : f32 to vector<1x128xf32>
    %488 = arith.addf %486, %487 : vector<1x128xf32>
    %cst_123 = arith.constant 5.000000e-01 : f32
    %489 = vector.broadcast %cst_123 : f32 to vector<1x128xf32>
    %490 = arith.mulf %489, %488 : vector<1x128xf32>
    %491 = vector.extract_strided_slice %470 {offsets = [4, 0, 0], sizes = [1, 1, 128], strides = [1, 1, 1]} : vector<8x1x128xf32> to vector<1x1x128xf32>
    %492 = vector.shape_cast %491 : vector<1x1x128xf32> to vector<1x128xf32>
    %cst_124 = arith.constant 1.000000e+00 : f32
    %493 = vector.broadcast %cst_124 : f32 to vector<1x128xf32>
    %494 = arith.addf %492, %493 : vector<1x128xf32>
    %cst_125 = arith.constant 5.000000e-01 : f32
    %495 = vector.broadcast %cst_125 : f32 to vector<1x128xf32>
    %496 = arith.mulf %495, %494 : vector<1x128xf32>
    %497 = vector.extract_strided_slice %470 {offsets = [5, 0, 0], sizes = [1, 1, 128], strides = [1, 1, 1]} : vector<8x1x128xf32> to vector<1x1x128xf32>
    %498 = vector.shape_cast %497 : vector<1x1x128xf32> to vector<1x128xf32>
    %cst_126 = arith.constant 1.000000e+00 : f32
    %499 = vector.broadcast %cst_126 : f32 to vector<1x128xf32>
    %500 = arith.addf %498, %499 : vector<1x128xf32>
    %cst_127 = arith.constant 5.000000e-01 : f32
    %501 = vector.broadcast %cst_127 : f32 to vector<1x128xf32>
    %502 = arith.mulf %501, %500 : vector<1x128xf32>
    %503 = vector.extract_strided_slice %470 {offsets = [6, 0, 0], sizes = [1, 1, 128], strides = [1, 1, 1]} : vector<8x1x128xf32> to vector<1x1x128xf32>
    %504 = vector.shape_cast %503 : vector<1x1x128xf32> to vector<1x128xf32>
    %505 = vector.extract_strided_slice %470 {offsets = [7, 0, 0], sizes = [1, 1, 128], strides = [1, 1, 1]} : vector<8x1x128xf32> to vector<1x1x128xf32>
    %506 = vector.shape_cast %505 : vector<1x1x128xf32> to vector<1x128xf32>
    %cst_128 = arith.constant 1.000000e+00 : f32
    %507 = vector.broadcast %cst_128 : f32 to vector<1x128xf32>
    %508 = arith.addf %506, %507 : vector<1x128xf32>
    %cst_129 = arith.constant 5.000000e-01 : f32
    %509 = vector.broadcast %cst_129 : f32 to vector<1x128xf32>
    %510 = arith.mulf %509, %508 : vector<1x128xf32>
    %511 = arith.mulf %482, %427 : vector<1x128xf32>
    %512 = arith.mulf %476, %484 : vector<1x128xf32>
    %513 = arith.addf %511, %512 : vector<1x128xf32>
    %514 = arith.mulf %502, %430 : vector<1x128xf32>
    %515 = arith.mulf %496, %504 : vector<1x128xf32>
    %516 = arith.addf %514, %515 : vector<1x128xf32>
    %517 = vector.shape_cast %513 : vector<1x128xf32> to vector<1x1x128xf32>
    %518 = vector.shape_cast %516 : vector<1x128xf32> to vector<1x1x128xf32>
    %519 = tpu.concatenate %517, %518 in 0 : vector<1x1x128xf32>, vector<1x1x128xf32> -> vector<2x1x128xf32>
    %520 = math.tanh %519 : vector<2x1x128xf32>
    %521 = vector.extract_strided_slice %520 {offsets = [0, 0, 0], sizes = [1, 1, 128], strides = [1, 1, 1]} : vector<2x1x128xf32> to vector<1x1x128xf32>
    %522 = vector.shape_cast %521 : vector<1x1x128xf32> to vector<1x128xf32>
    %523 = arith.mulf %490, %522 : vector<1x128xf32>
    %524 = vector.extract_strided_slice %520 {offsets = [1, 0, 0], sizes = [1, 1, 128], strides = [1, 1, 1]} : vector<2x1x128xf32> to vector<1x1x128xf32>
    %525 = vector.shape_cast %524 : vector<1x1x128xf32> to vector<1x128xf32>
    %526 = arith.mulf %510, %525 : vector<1x128xf32>
    %527 = arith.index_cast %c4_i32 : i32 to index
    %c0_130 = arith.constant 0 : index
    %c0_131 = arith.constant 0 : index
    %c0_132 = arith.constant 0 : index
    %528 = vector.load %arg5[%527, %c0_130, %c0_131, %c0_132] : memref<8x1x1x128xf32, #tpu.memory_space<vmem>>, vector<1x1x1x128xf32>
    %529 = vector.shape_cast %528 : vector<1x1x1x128xf32> to vector<1x128xf32>
    %530 = vector.shape_cast %526 : vector<1x128xf32> to vector<1x1x1x128xf32>
    tpu.vector_store %arg5[%527, %c0_130, %c0_131, %c0_132], %530 {strides = array<i32>} : memref<8x1x1x128xf32, #tpu.memory_space<vmem>>, vector<1x1x1x128xf32>,
    %c5_i32 = arith.constant 5 : i32
    %531 = arith.index_cast %c5_i32 : i32 to index
    %c0_133 = arith.constant 0 : index
    %c0_134 = arith.constant 0 : index
    %c0_135 = arith.constant 0 : index
    %532 = vector.load %arg4[%531, %c0_133, %c0_134, %c0_135] : memref<8x1x1x128xf32, #tpu.memory_space<vmem>>, vector<1x1x1x128xf32>
    %533 = vector.shape_cast %532 : vector<1x1x1x128xf32> to vector<1x128xf32>
    %534 = arith.mulf %523, %533 : vector<1x128xf32>
    %c1_i32_136 = arith.constant 1 : i32
    %535 = arith.addi %c5_i32, %c1_i32_136 : i32
    %536 = arith.index_cast %535 : i32 to index
    %c0_137 = arith.constant 0 : index
    %c0_138 = arith.constant 0 : index
    %c0_139 = arith.constant 0 : index
    %537 = vector.load %arg3[%536, %c0_137, %c0_138, %c0_139] : memref<8x1x1x128xf32, #tpu.memory_space<vmem>>, vector<1x1x1x128xf32>
    %538 = vector.shape_cast %537 : vector<1x1x1x128xf32> to vector<1x128xf32>
    %539 = vector.shape_cast %538 : vector<1x128xf32> to vector<1x1x128xf32>
    %540 = vector.broadcast %539 : vector<1x1x128xf32> to vector<4x1x128xf32>
    %541 = arith.mulf %8, %540 : vector<4x1x128xf32>
    %542 = vector.shape_cast %523 : vector<1x128xf32> to vector<1x1x128xf32>
    %543 = vector.broadcast %542 : vector<1x1x128xf32> to vector<4x1x128xf32>
    %544 = arith.mulf %17, %543 : vector<4x1x128xf32>
    %545 = arith.addf %541, %544 : vector<4x1x128xf32>
    %546 = arith.addf %545, %26 : vector<4x1x128xf32>
    %547 = vector.shape_cast %534 : vector<1x128xf32> to vector<1x1x128xf32>
    %548 = vector.broadcast %547 : vector<1x1x128xf32> to vector<4x1x128xf32>
    %549 = arith.mulf %35, %548 : vector<4x1x128xf32>
    %550 = vector.shape_cast %526 : vector<1x128xf32> to vector<1x1x128xf32>
    %551 = vector.broadcast %550 : vector<1x1x128xf32> to vector<4x1x128xf32>
    %552 = arith.mulf %44, %551 : vector<4x1x128xf32>
    %553 = arith.addf %549, %552 : vector<4x1x128xf32>
    %554 = arith.addf %553, %53 : vector<4x1x128xf32>
    %555 = tpu.concatenate %546, %554 in 0 : vector<4x1x128xf32>, vector<4x1x128xf32> -> vector<8x1x128xf32>
    %556 = math.tanh %555 : vector<8x1x128xf32>
    %557 = vector.extract_strided_slice %556 {offsets = [0, 0, 0], sizes = [1, 1, 128], strides = [1, 1, 1]} : vector<8x1x128xf32> to vector<1x1x128xf32>
    %558 = vector.shape_cast %557 : vector<1x1x128xf32> to vector<1x128xf32>
    %cst_140 = arith.constant 1.000000e+00 : f32
    %559 = vector.broadcast %cst_140 : f32 to vector<1x128xf32>
    %560 = arith.addf %558, %559 : vector<1x128xf32>
    %cst_141 = arith.constant 5.000000e-01 : f32
    %561 = vector.broadcast %cst_141 : f32 to vector<1x128xf32>
    %562 = arith.mulf %561, %560 : vector<1x128xf32>
    %563 = vector.extract_strided_slice %556 {offsets = [1, 0, 0], sizes = [1, 1, 128], strides = [1, 1, 1]} : vector<8x1x128xf32> to vector<1x1x128xf32>
    %564 = vector.shape_cast %563 : vector<1x1x128xf32> to vector<1x128xf32>
    %cst_142 = arith.constant 1.000000e+00 : f32
    %565 = vector.broadcast %cst_142 : f32 to vector<1x128xf32>
    %566 = arith.addf %564, %565 : vector<1x128xf32>
    %cst_143 = arith.constant 5.000000e-01 : f32
    %567 = vector.broadcast %cst_143 : f32 to vector<1x128xf32>
    %568 = arith.mulf %567, %566 : vector<1x128xf32>
    %569 = vector.extract_strided_slice %556 {offsets = [2, 0, 0], sizes = [1, 1, 128], strides = [1, 1, 1]} : vector<8x1x128xf32> to vector<1x1x128xf32>
    %570 = vector.shape_cast %569 : vector<1x1x128xf32> to vector<1x128xf32>
    %571 = vector.extract_strided_slice %556 {offsets = [3, 0, 0], sizes = [1, 1, 128], strides = [1, 1, 1]} : vector<8x1x128xf32> to vector<1x1x128xf32>
    %572 = vector.shape_cast %571 : vector<1x1x128xf32> to vector<1x128xf32>
    %cst_144 = arith.constant 1.000000e+00 : f32
    %573 = vector.broadcast %cst_144 : f32 to vector<1x128xf32>
    %574 = arith.addf %572, %573 : vector<1x128xf32>
    %cst_145 = arith.constant 5.000000e-01 : f32
    %575 = vector.broadcast %cst_145 : f32 to vector<1x128xf32>
    %576 = arith.mulf %575, %574 : vector<1x128xf32>
    %577 = vector.extract_strided_slice %556 {offsets = [4, 0, 0], sizes = [1, 1, 128], strides = [1, 1, 1]} : vector<8x1x128xf32> to vector<1x1x128xf32>
    %578 = vector.shape_cast %577 : vector<1x1x128xf32> to vector<1x128xf32>
    %cst_146 = arith.constant 1.000000e+00 : f32
    %579 = vector.broadcast %cst_146 : f32 to vector<1x128xf32>
    %580 = arith.addf %578, %579 : vector<1x128xf32>
    %cst_147 = arith.constant 5.000000e-01 : f32
    %581 = vector.broadcast %cst_147 : f32 to vector<1x128xf32>
    %582 = arith.mulf %581, %580 : vector<1x128xf32>
    %583 = vector.extract_strided_slice %556 {offsets = [5, 0, 0], sizes = [1, 1, 128], strides = [1, 1, 1]} : vector<8x1x128xf32> to vector<1x1x128xf32>
    %584 = vector.shape_cast %583 : vector<1x1x128xf32> to vector<1x128xf32>
    %cst_148 = arith.constant 1.000000e+00 : f32
    %585 = vector.broadcast %cst_148 : f32 to vector<1x128xf32>
    %586 = arith.addf %584, %585 : vector<1x128xf32>
    %cst_149 = arith.constant 5.000000e-01 : f32
    %587 = vector.broadcast %cst_149 : f32 to vector<1x128xf32>
    %588 = arith.mulf %587, %586 : vector<1x128xf32>
    %589 = vector.extract_strided_slice %556 {offsets = [6, 0, 0], sizes = [1, 1, 128], strides = [1, 1, 1]} : vector<8x1x128xf32> to vector<1x1x128xf32>
    %590 = vector.shape_cast %589 : vector<1x1x128xf32> to vector<1x128xf32>
    %591 = vector.extract_strided_slice %556 {offsets = [7, 0, 0], sizes = [1, 1, 128], strides = [1, 1, 1]} : vector<8x1x128xf32> to vector<1x1x128xf32>
    %592 = vector.shape_cast %591 : vector<1x1x128xf32> to vector<1x128xf32>
    %cst_150 = arith.constant 1.000000e+00 : f32
    %593 = vector.broadcast %cst_150 : f32 to vector<1x128xf32>
    %594 = arith.addf %592, %593 : vector<1x128xf32>
    %cst_151 = arith.constant 5.000000e-01 : f32
    %595 = vector.broadcast %cst_151 : f32 to vector<1x128xf32>
    %596 = arith.mulf %595, %594 : vector<1x128xf32>
    %597 = arith.mulf %568, %513 : vector<1x128xf32>
    %598 = arith.mulf %562, %570 : vector<1x128xf32>
    %599 = arith.addf %597, %598 : vector<1x128xf32>
    %600 = arith.mulf %588, %516 : vector<1x128xf32>
    %601 = arith.mulf %582, %590 : vector<1x128xf32>
    %602 = arith.addf %600, %601 : vector<1x128xf32>
    %603 = vector.shape_cast %599 : vector<1x128xf32> to vector<1x1x128xf32>
    %604 = vector.shape_cast %602 : vector<1x128xf32> to vector<1x1x128xf32>
    %605 = tpu.concatenate %603, %604 in 0 : vector<1x1x128xf32>, vector<1x1x128xf32> -> vector<2x1x128xf32>
    %606 = math.tanh %605 : vector<2x1x128xf32>
    %607 = vector.extract_strided_slice %606 {offsets = [0, 0, 0], sizes = [1, 1, 128], strides = [1, 1, 1]} : vector<2x1x128xf32> to vector<1x1x128xf32>
    %608 = vector.shape_cast %607 : vector<1x1x128xf32> to vector<1x128xf32>
    %609 = arith.mulf %576, %608 : vector<1x128xf32>
    %610 = vector.extract_strided_slice %606 {offsets = [1, 0, 0], sizes = [1, 1, 128], strides = [1, 1, 1]} : vector<2x1x128xf32> to vector<1x1x128xf32>
    %611 = vector.shape_cast %610 : vector<1x1x128xf32> to vector<1x128xf32>
    %612 = arith.mulf %596, %611 : vector<1x128xf32>
    %613 = arith.index_cast %c5_i32 : i32 to index
    %c0_152 = arith.constant 0 : index
    %c0_153 = arith.constant 0 : index
    %c0_154 = arith.constant 0 : index
    %614 = vector.load %arg5[%613, %c0_152, %c0_153, %c0_154] : memref<8x1x1x128xf32, #tpu.memory_space<vmem>>, vector<1x1x1x128xf32>
    %615 = vector.shape_cast %614 : vector<1x1x1x128xf32> to vector<1x128xf32>
    %616 = vector.shape_cast %612 : vector<1x128xf32> to vector<1x1x1x128xf32>
    tpu.vector_store %arg5[%613, %c0_152, %c0_153, %c0_154], %616 {strides = array<i32>} : memref<8x1x1x128xf32, #tpu.memory_space<vmem>>, vector<1x1x1x128xf32>,
    %c6_i32 = arith.constant 6 : i32
    %617 = arith.index_cast %c6_i32 : i32 to index
    %c0_155 = arith.constant 0 : index
    %c0_156 = arith.constant 0 : index
    %c0_157 = arith.constant 0 : index
    %618 = vector.load %arg4[%617, %c0_155, %c0_156, %c0_157] : memref<8x1x1x128xf32, #tpu.memory_space<vmem>>, vector<1x1x1x128xf32>
    %619 = vector.shape_cast %618 : vector<1x1x1x128xf32> to vector<1x128xf32>
    %620 = arith.mulf %609, %619 : vector<1x128xf32>
    %c1_i32_158 = arith.constant 1 : i32
    %621 = arith.addi %c6_i32, %c1_i32_158 : i32
    %622 = arith.index_cast %621 : i32 to index
    %c0_159 = arith.constant 0 : index
    %c0_160 = arith.constant 0 : index
    %c0_161 = arith.constant 0 : index
    %623 = vector.load %arg3[%622, %c0_159, %c0_160, %c0_161] : memref<8x1x1x128xf32, #tpu.memory_space<vmem>>, vector<1x1x1x128xf32>
    %624 = vector.shape_cast %623 : vector<1x1x1x128xf32> to vector<1x128xf32>
    %625 = vector.shape_cast %624 : vector<1x128xf32> to vector<1x1x128xf32>
    %626 = vector.broadcast %625 : vector<1x1x128xf32> to vector<4x1x128xf32>
    %627 = arith.mulf %8, %626 : vector<4x1x128xf32>
    %628 = vector.shape_cast %609 : vector<1x128xf32> to vector<1x1x128xf32>
    %629 = vector.broadcast %628 : vector<1x1x128xf32> to vector<4x1x128xf32>
    %630 = arith.mulf %17, %629 : vector<4x1x128xf32>
    %631 = arith.addf %627, %630 : vector<4x1x128xf32>
    %632 = arith.addf %631, %26 : vector<4x1x128xf32>
    %633 = vector.shape_cast %620 : vector<1x128xf32> to vector<1x1x128xf32>
    %634 = vector.broadcast %633 : vector<1x1x128xf32> to vector<4x1x128xf32>
    %635 = arith.mulf %35, %634 : vector<4x1x128xf32>
    %636 = vector.shape_cast %612 : vector<1x128xf32> to vector<1x1x128xf32>
    %637 = vector.broadcast %636 : vector<1x1x128xf32> to vector<4x1x128xf32>
    %638 = arith.mulf %44, %637 : vector<4x1x128xf32>
    %639 = arith.addf %635, %638 : vector<4x1x128xf32>
    %640 = arith.addf %639, %53 : vector<4x1x128xf32>
    %641 = tpu.concatenate %632, %640 in 0 : vector<4x1x128xf32>, vector<4x1x128xf32> -> vector<8x1x128xf32>
    %642 = math.tanh %641 : vector<8x1x128xf32>
    %643 = vector.extract_strided_slice %642 {offsets = [0, 0, 0], sizes = [1, 1, 128], strides = [1, 1, 1]} : vector<8x1x128xf32> to vector<1x1x128xf32>
    %644 = vector.shape_cast %643 : vector<1x1x128xf32> to vector<1x128xf32>
    %cst_162 = arith.constant 1.000000e+00 : f32
    %645 = vector.broadcast %cst_162 : f32 to vector<1x128xf32>
    %646 = arith.addf %644, %645 : vector<1x128xf32>
    %cst_163 = arith.constant 5.000000e-01 : f32
    %647 = vector.broadcast %cst_163 : f32 to vector<1x128xf32>
    %648 = arith.mulf %647, %646 : vector<1x128xf32>
    %649 = vector.extract_strided_slice %642 {offsets = [1, 0, 0], sizes = [1, 1, 128], strides = [1, 1, 1]} : vector<8x1x128xf32> to vector<1x1x128xf32>
    %650 = vector.shape_cast %649 : vector<1x1x128xf32> to vector<1x128xf32>
    %cst_164 = arith.constant 1.000000e+00 : f32
    %651 = vector.broadcast %cst_164 : f32 to vector<1x128xf32>
    %652 = arith.addf %650, %651 : vector<1x128xf32>
    %cst_165 = arith.constant 5.000000e-01 : f32
    %653 = vector.broadcast %cst_165 : f32 to vector<1x128xf32>
    %654 = arith.mulf %653, %652 : vector<1x128xf32>
    %655 = vector.extract_strided_slice %642 {offsets = [2, 0, 0], sizes = [1, 1, 128], strides = [1, 1, 1]} : vector<8x1x128xf32> to vector<1x1x128xf32>
    %656 = vector.shape_cast %655 : vector<1x1x128xf32> to vector<1x128xf32>
    %657 = vector.extract_strided_slice %642 {offsets = [3, 0, 0], sizes = [1, 1, 128], strides = [1, 1, 1]} : vector<8x1x128xf32> to vector<1x1x128xf32>
    %658 = vector.shape_cast %657 : vector<1x1x128xf32> to vector<1x128xf32>
    %cst_166 = arith.constant 1.000000e+00 : f32
    %659 = vector.broadcast %cst_166 : f32 to vector<1x128xf32>
    %660 = arith.addf %658, %659 : vector<1x128xf32>
    %cst_167 = arith.constant 5.000000e-01 : f32
    %661 = vector.broadcast %cst_167 : f32 to vector<1x128xf32>
    %662 = arith.mulf %661, %660 : vector<1x128xf32>
    %663 = vector.extract_strided_slice %642 {offsets = [4, 0, 0], sizes = [1, 1, 128], strides = [1, 1, 1]} : vector<8x1x128xf32> to vector<1x1x128xf32>
    %664 = vector.shape_cast %663 : vector<1x1x128xf32> to vector<1x128xf32>
    %cst_168 = arith.constant 1.000000e+00 : f32
    %665 = vector.broadcast %cst_168 : f32 to vector<1x128xf32>
    %666 = arith.addf %664, %665 : vector<1x128xf32>
    %cst_169 = arith.constant 5.000000e-01 : f32
    %667 = vector.broadcast %cst_169 : f32 to vector<1x128xf32>
    %668 = arith.mulf %667, %666 : vector<1x128xf32>
    %669 = vector.extract_strided_slice %642 {offsets = [5, 0, 0], sizes = [1, 1, 128], strides = [1, 1, 1]} : vector<8x1x128xf32> to vector<1x1x128xf32>
    %670 = vector.shape_cast %669 : vector<1x1x128xf32> to vector<1x128xf32>
    %cst_170 = arith.constant 1.000000e+00 : f32
    %671 = vector.broadcast %cst_170 : f32 to vector<1x128xf32>
    %672 = arith.addf %670, %671 : vector<1x128xf32>
    %cst_171 = arith.constant 5.000000e-01 : f32
    %673 = vector.broadcast %cst_171 : f32 to vector<1x128xf32>
    %674 = arith.mulf %673, %672 : vector<1x128xf32>
    %675 = vector.extract_strided_slice %642 {offsets = [6, 0, 0], sizes = [1, 1, 128], strides = [1, 1, 1]} : vector<8x1x128xf32> to vector<1x1x128xf32>
    %676 = vector.shape_cast %675 : vector<1x1x128xf32> to vector<1x128xf32>
    %677 = vector.extract_strided_slice %642 {offsets = [7, 0, 0], sizes = [1, 1, 128], strides = [1, 1, 1]} : vector<8x1x128xf32> to vector<1x1x128xf32>
    %678 = vector.shape_cast %677 : vector<1x1x128xf32> to vector<1x128xf32>
    %cst_172 = arith.constant 1.000000e+00 : f32
    %679 = vector.broadcast %cst_172 : f32 to vector<1x128xf32>
    %680 = arith.addf %678, %679 : vector<1x128xf32>
    %cst_173 = arith.constant 5.000000e-01 : f32
    %681 = vector.broadcast %cst_173 : f32 to vector<1x128xf32>
    %682 = arith.mulf %681, %680 : vector<1x128xf32>
    %683 = arith.mulf %654, %599 : vector<1x128xf32>
    %684 = arith.mulf %648, %656 : vector<1x128xf32>
    %685 = arith.addf %683, %684 : vector<1x128xf32>
    %686 = arith.mulf %674, %602 : vector<1x128xf32>
    %687 = arith.mulf %668, %676 : vector<1x128xf32>
    %688 = arith.addf %686, %687 : vector<1x128xf32>
    %689 = vector.shape_cast %685 : vector<1x128xf32> to vector<1x1x128xf32>
    %690 = vector.shape_cast %688 : vector<1x128xf32> to vector<1x1x128xf32>
    %691 = tpu.concatenate %689, %690 in 0 : vector<1x1x128xf32>, vector<1x1x128xf32> -> vector<2x1x128xf32>
    %692 = math.tanh %691 : vector<2x1x128xf32>
    %693 = vector.extract_strided_slice %692 {offsets = [0, 0, 0], sizes = [1, 1, 128], strides = [1, 1, 1]} : vector<2x1x128xf32> to vector<1x1x128xf32>
    %694 = vector.shape_cast %693 : vector<1x1x128xf32> to vector<1x128xf32>
    %695 = arith.mulf %662, %694 : vector<1x128xf32>
    %696 = vector.extract_strided_slice %692 {offsets = [1, 0, 0], sizes = [1, 1, 128], strides = [1, 1, 1]} : vector<2x1x128xf32> to vector<1x1x128xf32>
    %697 = vector.shape_cast %696 : vector<1x1x128xf32> to vector<1x128xf32>
    %698 = arith.mulf %682, %697 : vector<1x128xf32>
    %699 = arith.index_cast %c6_i32 : i32 to index
    %c0_174 = arith.constant 0 : index
    %c0_175 = arith.constant 0 : index
    %c0_176 = arith.constant 0 : index
    %700 = vector.load %arg5[%699, %c0_174, %c0_175, %c0_176] : memref<8x1x1x128xf32, #tpu.memory_space<vmem>>, vector<1x1x1x128xf32>
    %701 = vector.shape_cast %700 : vector<1x1x1x128xf32> to vector<1x128xf32>
    %702 = vector.shape_cast %698 : vector<1x128xf32> to vector<1x1x1x128xf32>
    tpu.vector_store %arg5[%699, %c0_174, %c0_175, %c0_176], %702 {strides = array<i32>} : memref<8x1x1x128xf32, #tpu.memory_space<vmem>>, vector<1x1x1x128xf32>,
    %c7_i32 = arith.constant 7 : i32
    %c7_177 = arith.constant 7 : index
    %c0_178 = arith.constant 0 : index
    %c0_179 = arith.constant 0 : index
    %c0_180 = arith.constant 0 : index
    %703 = vector.load %arg4[%c7_177, %c0_178, %c0_179, %c0_180] : memref<8x1x1x128xf32, #tpu.memory_space<vmem>>, vector<1x1x1x128xf32>
    %704 = vector.shape_cast %703 : vector<1x1x1x128xf32> to vector<1x128xf32>
    %705 = arith.mulf %695, %704 : vector<1x128xf32>
    %706 = vector.shape_cast %705 : vector<1x128xf32> to vector<1x1x128xf32>
    %707 = vector.broadcast %706 : vector<1x1x128xf32> to vector<4x1x128xf32>
    %708 = arith.mulf %35, %707 : vector<4x1x128xf32>
    %709 = vector.shape_cast %698 : vector<1x128xf32> to vector<1x1x128xf32>
    %710 = vector.broadcast %709 : vector<1x1x128xf32> to vector<4x1x128xf32>
    %711 = arith.mulf %44, %710 : vector<4x1x128xf32>
    %712 = arith.addf %708, %711 : vector<4x1x128xf32>
    %713 = arith.addf %712, %53 : vector<4x1x128xf32>
    %714 = math.tanh %713 : vector<4x1x128xf32>
    %715 = vector.extract_strided_slice %714 {offsets = [0, 0, 0], sizes = [1, 1, 128], strides = [1, 1, 1]} : vector<4x1x128xf32> to vector<1x1x128xf32>
    %716 = vector.shape_cast %715 : vector<1x1x128xf32> to vector<1x128xf32>
    %cst_181 = arith.constant 1.000000e+00 : f32
    %717 = vector.broadcast %cst_181 : f32 to vector<1x128xf32>
    %718 = arith.addf %716, %717 : vector<1x128xf32>
    %cst_182 = arith.constant 5.000000e-01 : f32
    %719 = vector.broadcast %cst_182 : f32 to vector<1x128xf32>
    %720 = arith.mulf %719, %718 : vector<1x128xf32>
    %721 = vector.extract_strided_slice %714 {offsets = [1, 0, 0], sizes = [1, 1, 128], strides = [1, 1, 1]} : vector<4x1x128xf32> to vector<1x1x128xf32>
    %722 = vector.shape_cast %721 : vector<1x1x128xf32> to vector<1x128xf32>
    %cst_183 = arith.constant 1.000000e+00 : f32
    %723 = vector.broadcast %cst_183 : f32 to vector<1x128xf32>
    %724 = arith.addf %722, %723 : vector<1x128xf32>
    %cst_184 = arith.constant 5.000000e-01 : f32
    %725 = vector.broadcast %cst_184 : f32 to vector<1x128xf32>
    %726 = arith.mulf %725, %724 : vector<1x128xf32>
    %727 = vector.extract_strided_slice %714 {offsets = [2, 0, 0], sizes = [1, 1, 128], strides = [1, 1, 1]} : vector<4x1x128xf32> to vector<1x1x128xf32>
    %728 = vector.shape_cast %727 : vector<1x1x128xf32> to vector<1x128xf32>
    %729 = vector.extract_strided_slice %714 {offsets = [3, 0, 0], sizes = [1, 1, 128], strides = [1, 1, 1]} : vector<4x1x128xf32> to vector<1x1x128xf32>
    %730 = vector.shape_cast %729 : vector<1x1x128xf32> to vector<1x128xf32>
    %cst_185 = arith.constant 1.000000e+00 : f32
    %731 = vector.broadcast %cst_185 : f32 to vector<1x128xf32>
    %732 = arith.addf %730, %731 : vector<1x128xf32>
    %cst_186 = arith.constant 5.000000e-01 : f32
    %733 = vector.broadcast %cst_186 : f32 to vector<1x128xf32>
    %734 = arith.mulf %733, %732 : vector<1x128xf32>
    %735 = arith.mulf %726, %688 : vector<1x128xf32>
    %736 = arith.mulf %720, %728 : vector<1x128xf32>
    %737 = arith.addf %735, %736 : vector<1x128xf32>
    %738 = math.tanh %737 : vector<1x128xf32>
    %739 = arith.mulf %734, %738 : vector<1x128xf32>
    %c7_187 = arith.constant 7 : index
    %c0_188 = arith.constant 0 : index
    %c0_189 = arith.constant 0 : index
    %c0_190 = arith.constant 0 : index
    %740 = vector.load %arg5[%c7_187, %c0_188, %c0_189, %c0_190] : memref<8x1x1x128xf32, #tpu.memory_space<vmem>>, vector<1x1x1x128xf32>
    %741 = vector.shape_cast %740 : vector<1x1x1x128xf32> to vector<1x128xf32>
    %742 = vector.shape_cast %739 : vector<1x128xf32> to vector<1x1x1x128xf32>
    tpu.vector_store %arg5[%c7_187, %c0_188, %c0_189, %c0_190], %742 {strides = array<i32>} : memref<8x1x1x128xf32, #tpu.memory_space<vmem>>, vector<1x1x1x128xf32>,
    %c0_191 = arith.constant 0 : index
    %c0_192 = arith.constant 0 : index
    %c0_193 = arith.constant 0 : index
    %743 = vector.load %arg6[%c0_191, %c0_192, %c0_193] : memref<4x1x128xf32, #tpu.memory_space<vmem>>, vector<1x1x128xf32>
    %744 = vector.shape_cast %743 : vector<1x1x128xf32> to vector<1x128xf32>
    %745 = vector.shape_cast %695 : vector<1x128xf32> to vector<1x1x128xf32>
    tpu.vector_store %arg6[%c0_191, %c0_192, %c0_193], %745 {strides = array<i32>} : memref<4x1x128xf32, #tpu.memory_space<vmem>>, vector<1x1x128xf32>,
    %c1_194 = arith.constant 1 : index
    %c0_195 = arith.constant 0 : index
    %c0_196 = arith.constant 0 : index
    %746 = vector.load %arg6[%c1_194, %c0_195, %c0_196] : memref<4x1x128xf32, #tpu.memory_space<vmem>>, vector<1x1x128xf32>
    %747 = vector.shape_cast %746 : vector<1x1x128xf32> to vector<1x128xf32>
    %748 = vector.shape_cast %685 : vector<1x128xf32> to vector<1x1x128xf32>
    tpu.vector_store %arg6[%c1_194, %c0_195, %c0_196], %748 {strides = array<i32>} : memref<4x1x128xf32, #tpu.memory_space<vmem>>, vector<1x1x128xf32>,
    %c2_197 = arith.constant 2 : index
    %c0_198 = arith.constant 0 : index
    %c0_199 = arith.constant 0 : index
    %749 = vector.load %arg6[%c2_197, %c0_198, %c0_199] : memref<4x1x128xf32, #tpu.memory_space<vmem>>, vector<1x1x128xf32>
    %750 = vector.shape_cast %749 : vector<1x1x128xf32> to vector<1x128xf32>
    %751 = vector.shape_cast %739 : vector<1x128xf32> to vector<1x1x128xf32>
    tpu.vector_store %arg6[%c2_197, %c0_198, %c0_199], %751 {strides = array<i32>} : memref<4x1x128xf32, #tpu.memory_space<vmem>>, vector<1x1x128xf32>,
    %c3_200 = arith.constant 3 : index
    %c0_201 = arith.constant 0 : index
    %c0_202 = arith.constant 0 : index
    %752 = vector.load %arg6[%c3_200, %c0_201, %c0_202] : memref<4x1x128xf32, #tpu.memory_space<vmem>>, vector<1x1x128xf32>
    %753 = vector.shape_cast %752 : vector<1x1x128xf32> to vector<1x128xf32>
    %754 = vector.shape_cast %737 : vector<1x128xf32> to vector<1x1x128xf32>
    tpu.vector_store %arg6[%c3_200, %c0_201, %c0_202], %754 {strides = array<i32>} : memref<4x1x128xf32, #tpu.memory_space<vmem>>, vector<1x1x128xf32>,
    return
  }
  func.func @transform_0(%arg0: i32, %arg1: i32) -> i32 {
    %c0_i32 = arith.constant 0 : i32
    %c0_i32_0 = arith.constant 0 : i32
    return %c0_i32 : i32
  }
  func.func @transform_1(%arg0: i32, %arg1: i32) -> (i32, i32, i32, i32) {
    %c0_i32 = arith.constant 0 : i32
    %c0_i32_0 = arith.constant 0 : i32
    %c0_i32_1 = arith.constant 0 : i32
    return %arg1, %arg0, %c0_i32, %c0_i32_0 : i32, i32, i32, i32
  }
  func.func @transform_2(%arg0: i32, %arg1: i32) -> (i32, i32, i32, i32) {
    %c0_i32 = arith.constant 0 : i32
    %c0_i32_0 = arith.constant 0 : i32
    %c0_i32_1 = arith.constant 0 : i32
    return %arg1, %arg0, %c0_i32, %c0_i32_0 : i32, i32, i32, i32
  }
  func.func @transform_3(%arg0: i32, %arg1: i32) -> (i32, i32, i32, i32) {
    %c0_i32 = arith.constant 0 : i32
    %c0_i32_0 = arith.constant 0 : i32
    %c0_i32_1 = arith.constant 0 : i32
    return %arg1, %arg0, %c0_i32, %c0_i32_0 : i32, i32, i32, i32
  }
}

</mosaic_0001>

<bundles_post_ra>
// kernel: tpu_custom_call.1
= control target key start
LH: loop header
LB: loop body
LE: loop exit
PB: predicated region body
PF: predicated region fallthrough
CT: control target
= control target key end

     0   :  { %8 = vsyncpa [#allocation6], 0  ;;  %s1351_s0 = inlined_call_operand.hbm [shape: f32[24], index: 0, kind: input, shape index: {}]   ;;  %s1352_s1 = inlined_call_operand.hbm [shape: f32[8,1,1,128], index: 1, kind: input, shape index: {}]   ;;  %s1353_s2 = inlined_call_operand.hbm [shape: f32[8,1,1,128], index: 2, kind: input, shape index: {}]   ;;  %s1354_s3 = inlined_call_operand.hbm [shape: f32[8,1,1,128], index: 3, kind: output, shape index: {}]  }
   0x1   :  { %9 = vsyncpa [#allocation4], 0 }
   0x2   :  { %10 = vsyncpa [#allocation9], 0 }
   0x3   :  { %11 = vsyncpa [#allocation5], 0  ;;  %s879_s14 = scalar_lea.hbm %s1351_s0, 16 }
   0x4   :  { %p880_p0 = scmp.ne.s32.totalorder %s1351_s0, %s879_s14  ;;  %p883_p1 = scmp.lt.u32.totalorder %s879_s14, %s1351_s0 }
   0x6   :  { %p885_p2 = pnand %p883_p1, %p880_p0 }
   0x8   :  { %888 = shalt.err (!%p885_p2)
}
   0x9   :  { %s963_s19 = smov [#allocation3]   ;;  %s964_s22 = smov [#allocation7]  }
   0xa   :  { %19 = dma.hbm_to_smem %s1351_s0, 16, %s963_s19, [#allocation6]  }
   0xb   :  { %s25_s23 = sshll.u32 %s964_s22, 4  ;;  %s889_s26 = scalar_lea.hbm %s1352_s1, 128  ;;  %s26_s23 = int_to_ptr.vmem [resolvable:$true] %s25_s23 }
   0xc   :  { %p890_p3 = scmp.ne.s32.totalorder %s1352_s1, %s889_s26  ;;  %p893_p4 = scmp.lt.u32.totalorder %s889_s26, %s1352_s1 }
   0xe   :  { %p895_p5 = pnand %p893_p4, %p890_p3 }
  0x10   :  { %898 = shalt.err (!%p895_p5)
}
  0x11   :  { %s899_s4 = scalar_lea.vmem %s26_s23, 128  ;;  %p904_p7 = scmp.lt.s32.totalorder %s26_s23, %s26_s23 }
  0x12   :  { %p900_p6 = scmp.ne.s32.totalorder %s26_s23, %s899_s4  ;;  %p905_p8 = scmp.lt.s32.totalorder %s899_s4, %s899_s4 }
  0x14   :  { %p906_p9 = por %p905_p8, %p904_p7 }
  0x16   :  { %p907_p10 = pnand %p906_p9, %p900_p6 }
  0x18   :  { %910 = shalt.err (!%p907_p10)
}
  0x19   :  { %s965_s0 = smov 16   ;;  %s966_s5 = smov 1  }
  0x1a   :  { %31 = dma.hbm_to_vmem [thread:$0]  %s1352_s1, 128, %s26_s23, [#allocation4], %s965_s0, %s965_s0, %s966_s5  }
  0x1b   :  { %s967_s8 = smov [#allocation8]   ;;  %s911_s12 = scalar_lea.hbm %s1353_s2, 128 }
  0x1c   :  { %s37_s9 = sshll.u32 %s967_s8, 4  ;;  %p912_p11 = scmp.ne.s32.totalorder %s1353_s2, %s911_s12  ;;  %s38_s9 = int_to_ptr.vmem [resolvable:$true] %s37_s9 }
  0x1d   :  { %p915_p12 = scmp.lt.u32.totalorder %s911_s12, %s1353_s2 }
  0x1f   :  { %p917_p13 = pnand %p915_p12, %p912_p11 }
  0x21   :  { %920 = shalt.err (!%p917_p13)
}
  0x22   :  { %s921_s17 = scalar_lea.vmem %s38_s9, 128  ;;  %p926_p1 = scmp.lt.s32.totalorder %s38_s9, %s38_s9 }
  0x23   :  { %p922_p0 = scmp.ne.s32.totalorder %s38_s9, %s921_s17  ;;  %p927_p2 = scmp.lt.s32.totalorder %s921_s17, %s921_s17 }
  0x25   :  { %p928_p3 = por %p927_p2, %p926_p1 }
  0x27   :  { %p929_p4 = pnand %p928_p3, %p922_p0 }
  0x29   :  { %932 = shalt.err (!%p929_p4)
}
  0x2a   :  { %43 = dma.hbm_to_vmem [thread:$0]  %s1353_s2, 128, %s38_s9, [#allocation9], %s965_s0, %s965_s0, %s966_s5  }
  0x2b   :  { %955 = dma.done.wait [#allocation6], 16  }
  0x2c   :  { %956 = vsyncadd [#allocation6], 4294967280 }
  0x2d   :  { %957 = dma.done.wait [#allocation4], 128  }
  0x2e   :  { %958 = vsyncadd [#allocation4], 4294967168 }
  0x2f   :  { %959 = dma.done.wait [#allocation9], 128  }
  0x30   :  { %960 = vsyncadd [#allocation9], 4294967168 }
  0x31   :  { %53 = sfence }
  0x32   :  { %s54_s19 = sld [smem:[#allocation3]]  ;;  %s689_s20 = sld [smem:[#allocation3 + $0x1]]  ;;  %v968_v0 = vmov 0.0   ;;  %v117_v1 = vld [vmem:[#allocation7] sm:$0x1] }
  0x33   :  { %s690_s21 = sld [smem:[#allocation3 + $0x2]]  ;;  %106 = vst [vmem:[#allocation2] sm:$0x1] %v968_v0  ;;  %107 = vst [vmem:[#allocation2 + $0x1] sm:$0x1] %v968_v0  ;;  %s692_s22 = sld [smem:[#allocation3 + $0x4]] }
  0x34   :  { %108 = vst [vmem:[#allocation2 + $0x2] sm:$0x1] %v968_v0  ;;  %109 = vst [vmem:[#allocation2 + $0x3] sm:$0x1] %v968_v0  ;;  %s693_s23 = sld [smem:[#allocation3 + $0x5]]  ;;  %s694_s24 = sld [smem:[#allocation3 + $0x6]] }
  0x35   :  { %s696_s25 = sld [smem:[#allocation3 + $0x8]]  ;;  %s698_s2 = sld [smem:[#allocation3 + $0xa]]  ;;  %v152_v44 = vld [vmem:[#allocation7 + $0x1] sm:$0x1]  ;;  %v149_v54 = vld [vmem:[#allocation8] sm:$0x1] }
  0x36   :  { %s697_s26 = sld [smem:[#allocation3 + $0x9]]  ;;  %s691_s27 = sld [smem:[#allocation3 + $0x3]] }
  0x37   :  { %s695_s28 = sld [smem:[#allocation3 + $0x7]]  ;;  %s699_s29 = sld [smem:[#allocation3 + $0xb]] }
  0x38   :  { %v1032_v2 = vstv %s54_s19  ;;  %v1034_v3 = vstv %s689_s20  ;;  %s700_s30 = sld [smem:[#allocation3 + $0xc]]  ;;  %s704_s4 = sld [smem:[#allocation3 + $0x10]] }
  0x39   :  { %v1036_v4 = vstv %s690_s21  ;;  %v118_v5 = vmul.f32 %v117_v1, %v1032_v2  ;;  %v119_v6 = vmul.f32 %v117_v1, %v1034_v3  ;;  %v1040_v7 = vstv %s692_s22  ;;  %s705_s6 = sld [smem:[#allocation3 + $0x11]]  ;;  %s701_s7 = sld [smem:[#allocation3 + $0xd]] }
  0x3a   :  { %v1042_v8 = vstv %s693_s23  ;;  %v110_v9 = vld [vmem:[#allocation2] sm:$0x1]  ;;  %v120_v10 = vmul.f32 %v117_v1, %v1036_v4  ;;  %v1045_v11 = vstv %s694_s24  ;;  %v112_v37 = vld [vmem:[#allocation2 + $0x1] sm:$0x1]  ;;  %s706_s8 = sld [smem:[#allocation3 + $0x12]]  ;;  %s702_s9 = sld [smem:[#allocation3 + $0xe]]  ;;  %v153_v47 = vmul.f32 %v152_v44, %v1032_v2 }
  0x3b   :  { %v122_v12 = vmul.f32 %v110_v9, %v1040_v7  ;;  %v123_v13 = vmul.f32 %v110_v9, %v1042_v8  ;;  %v1049_v14 = vstv %s696_s25  ;;  %v124_v15 = vmul.f32 %v110_v9, %v1045_v11  ;;  %s1071_s10 = sld [smem:[#allocation3 + $0x14]]  ;;  %s1073_s11 = sld [smem:[#allocation3 + $0x15]]  ;;  %v114_v53 = vld [vmem:[#allocation2 + $0x2] sm:$0x1] }
  0x3c   :  { %v1052_v18 = vstv %s697_s26  ;;  %v1054_v20 = vstv %s698_s2  ;;  %v1057_v22 = vstv %s691_s27  ;;  %v154_v48 = vmul.f32 %v152_v44, %v1034_v3  ;;  %s1077_s12 = sld [smem:[#allocation3 + $0xf]]  ;;  %s1084_s13 = sld [smem:[#allocation3 + $0x13]] }
  0x3d   :  { %v126_v16 = vadd.f32 %v122_v12, %v118_v5  ;;  %v127_v17 = vadd.f32 %v123_v13, %v119_v6  ;;  %v128_v19 = vadd.f32 %v124_v15, %v120_v10  ;;  %v1059_v23 = vstv %s695_s28  ;;  %s710_s14 = sld [smem:[#allocation3 + $0x16]]  ;;  %s711_s15 = sld [smem:[#allocation3 + $0x17]] }
  0x3e   :  { %v121_v26 = vmul.f32 %v117_v1, %v1057_v22  ;;  %v125_v27 = vmul.f32 %v110_v9, %v1059_v23  ;;  %v1065_v29 = vstv %s699_s29  ;;  %v155_v50 = vmul.f32 %v152_v44, %v1036_v4  ;;  %s969_s16 = smov [#allocation10]  }
  0x3f   :  { %v130_v21 = vadd.f32 %v126_v16, %v1049_v14  ;;  %v131_v24 = vadd.f32 %v127_v17, %v1052_v18  ;;  %v132_v25 = vadd.f32 %v128_v19, %v1054_v20  ;;  %v1080_v51 = vstv %s704_s4  ;;  %s675_s17 = sshll.u32 %s969_s16, 4  ;;  %s676_s17 = int_to_ptr.vmem [resolvable:$true] %s675_s17 }
  0x40   :  { %v129_v28 = vadd.f32 %v125_v27, %v121_v26  ;;  %v1082_v52 = vstv %s705_s6  ;;  %v1086_v55 = vstv %s700_s30  ;;  %v1088_v56 = vstv %s701_s7  ;;  %s933_s1 = scalar_lea.vmem %s676_s17, 128  ;;  %p938_p6 = scmp.lt.s32.totalorder %s676_s17, %s676_s17 }
  0x41   :  { %719 = vtanh.f32 %v130_v21  ;;  %v1090_v57 = vstv %s706_s8  ;;  %v1095_v61 = vstv %s702_s9  ;;  %v173_v63 = vmul.f32 %v114_v53, %v1080_v51  ;;  %p934_p5 = scmp.ne.s32.totalorder %s676_s17, %s933_s1  ;;  %p939_p7 = scmp.lt.s32.totalorder %s933_s1, %s933_s1 }
  0x42   :  { %721 = vtanh.f32 %v131_v24  ;;  %v133_v31 = vadd.f32 %v129_v28, %v1065_v29  ;;  %v174_v0 = vmul.f32 %v114_v53, %v1082_v52  ;;  %v175_v9 = vmul.f32 %v114_v53, %v1090_v57 }
  0x43   :  { %723 = vtanh.f32 %v132_v25  ;;  %v156_v10 = vmul.f32 %v152_v44, %v1057_v22  ;;  %v1107_v19 = vstv %s1071_s10  ;;  %v1110_v21 = vstv %s1073_s11  ;;  %p940_p8 = por %p939_p7, %p938_p6 }
  0x44   :  { %725 = vtanh.f32 %v133_v31  ;;  %v1114_v25 = vstv %s1077_s12 }
  0x45   :  { %p941_p9 = pnand %p940_p8, %p934_p5 }
  0x4b   :  { %v720_v30 = vpop.eup %719 }
  0x4c   :  { %v138_v32 = vadd.f32 1.0, %v720_v30  ;;  %v722_v33 = vpop.eup %721  ;;  %v1118_v30 = vstv %s1084_s13 }
  0x4d   :  { %v140_v35 = vadd.f32 1.0, %v722_v33  ;;  %v724_v36 = vpop.eup %723 }
  0x4e   :  { %v139_v34 = vmul.f32 0.5, %v138_v32  ;;  %v726_v42 = vpop.eup %725  ;;  %v1120_v32 = vstv %s710_s14 }
  0x4f   :  { %v141_v38 = vmul.f32 0.5, %v140_v35  ;;  %v142_v43 = vadd.f32 1.0, %v726_v42  ;;  %v1128_v42 = vstv %s711_s15 }
  0x50   :  { %v145_v39 = vmul.f32 %v724_v36, %v139_v34  ;;  %v176_v36 = vmul.f32 %v114_v53, %v1118_v30 }
  0x51   :  { %v144_v40 = vmul.f32 %v141_v38, %v112_v37  ;;  %v143_v45 = vmul.f32 0.5, %v142_v43 }
  0x53   :  { %v1068_v41 = vadd.f32 %v145_v39, %v144_v40 }
  0x55   :  { %727 = vtanh.f32 %v1068_v41 }
  0x5f   :  { %v728_v46 = vpop.eup %727 }
  0x60   :  { %v148_v49 = vmul.f32 %v728_v46, %v143_v45 }
  0x62   :  { %v157_v58 = vmul.f32 %v148_v49, %v1040_v7  ;;  %v158_v59 = vmul.f32 %v148_v49, %v1042_v8  ;;  %v159_v60 = vmul.f32 %v148_v49, %v1045_v11  ;;  %v150_v62 = vmul.f32 %v149_v54, %v148_v49 }
  0x63   :  { %v160_v28 = vmul.f32 %v148_v49, %v1059_v23 }
  0x64   :  { %v161_v1 = vadd.f32 %v157_v58, %v153_v47  ;;  %v162_v5 = vadd.f32 %v158_v59, %v154_v48  ;;  %v163_v6 = vadd.f32 %v159_v60, %v155_v50  ;;  %v169_v12 = vmul.f32 %v150_v62, %v1086_v55 }
  0x65   :  { %v170_v13 = vmul.f32 %v150_v62, %v1088_v56  ;;  %v171_v15 = vmul.f32 %v150_v62, %v1095_v61  ;;  %v172_v35 = vmul.f32 %v150_v62, %v1114_v25  ;;  %v164_v37 = vadd.f32 %v160_v28, %v156_v10 }
  0x66   :  { %v165_v16 = vadd.f32 %v161_v1, %v1049_v14  ;;  %v166_v17 = vadd.f32 %v162_v5, %v1052_v18  ;;  %v167_v24 = vadd.f32 %v163_v6, %v1054_v20  ;;  %v177_v26 = vadd.f32 %v173_v63, %v169_v12  ;;  %v116_v63 = vld [vmem:[#allocation2 + $0x3] sm:$0x1] }
  0x67   :  { %v178_v27 = vadd.f32 %v174_v0, %v170_v13  ;;  %v179_v31 = vadd.f32 %v175_v9, %v171_v15  ;;  %v180_v39 = vadd.f32 %v176_v36, %v172_v35  ;;  %v168_v40 = vadd.f32 %v164_v37, %v1065_v29 }
  0x68   :  { %729 = vtanh.f32 %v165_v16  ;;  %v181_v33 = vadd.f32 %v177_v26, %v1107_v19 }
  0x69   :  { %731 = vtanh.f32 %v166_v17  ;;  %v182_v34 = vadd.f32 %v178_v27, %v1110_v21  ;;  %v183_v38 = vadd.f32 %v179_v31, %v1120_v32  ;;  %v184_v46 = vadd.f32 %v180_v39, %v1128_v42  ;;  %v220_v17 = vld [vmem:[#allocation7 + $0x2] sm:$0x1]  ;;  %v217_v27 = vld [vmem:[#allocation8 + $0x1] sm:$0x1] }
  0x6a   :  { %733 = vtanh.f32 %v167_v24  ;;  %v221_v31 = vmul.f32 %v220_v17, %v1032_v2 }
  0x6b   :  { %735 = vtanh.f32 %v181_v33  ;;  %v222_v33 = vmul.f32 %v220_v17, %v1034_v3 }
  0x6c   :  { %737 = vtanh.f32 %v182_v34  ;;  %v223_v34 = vmul.f32 %v220_v17, %v1036_v4 }
  0x6d   :  { %739 = vtanh.f32 %v183_v38 }
  0x6e   :  { %741 = vtanh.f32 %v168_v40 }
  0x6f   :  { %743 = vtanh.f32 %v184_v46 }
  0x72   :  { %v730_v43 = vpop.eup %729 }
  0x73   :  { %v732_v44 = vpop.eup %731  ;;  %v193_v45 = vadd.f32 1.0, %v730_v43 }
  0x74   :  { %v195_v47 = vadd.f32 1.0, %v732_v44  ;;  %v734_v48 = vpop.eup %733 }
  0x75   :  { %v194_v49 = vmul.f32 0.5, %v193_v45  ;;  %v736_v50 = vpop.eup %735 }
  0x76   :  { %v196_v53 = vmul.f32 0.5, %v195_v47  ;;  %v738_v54 = vpop.eup %737  ;;  %v199_v59 = vadd.f32 1.0, %v736_v50 }
  0x77   :  { %v206_v58 = vmul.f32 %v734_v48, %v194_v49  ;;  %v201_v62 = vadd.f32 1.0, %v738_v54  ;;  %v740_v1 = vpop.eup %739 }
  0x78   :  { %v205_v60 = vmul.f32 %v196_v53, %v1068_v41  ;;  %v200_v0 = vmul.f32 0.5, %v199_v59  ;;  %v742_v12 = vpop.eup %741 }
  0x79   :  { %v202_v6 = vmul.f32 0.5, %v201_v62  ;;  %v744_v15 = vpop.eup %743  ;;  %v197_v16 = vadd.f32 1.0, %v742_v12 }
  0x7a   :  { %v1132_v5 = vadd.f32 %v206_v58, %v205_v60  ;;  %v209_v9 = vmul.f32 %v740_v1, %v200_v0  ;;  %v203_v41 = vadd.f32 1.0, %v744_v15  ;;  %v224_v58 = vmul.f32 %v220_v17, %v1057_v22 }
  0x7b   :  { %v208_v10 = vmul.f32 %v202_v6, %v116_v63  ;;  %v198_v24 = vmul.f32 0.5, %v197_v16 }
  0x7c   :  { %745 = vtanh.f32 %v1132_v5  ;;  %v204_v35 = vmul.f32 0.5, %v203_v41 }
  0x7d   :  { %v1135_v13 = vadd.f32 %v209_v9, %v208_v10 }
  0x7f   :  { %747 = vtanh.f32 %v1135_v13 }
  0x86   :  { %v746_v26 = vpop.eup %745 }
  0x87   :  { %v213_v28 = vmul.f32 %v746_v26, %v198_v24 }
  0x89   :  { %v225_v36 = vmul.f32 %v213_v28, %v1040_v7  ;;  %v226_v37 = vmul.f32 %v213_v28, %v1042_v8  ;;  %v227_v38 = vmul.f32 %v213_v28, %v1045_v11  ;;  %v218_v39 = vmul.f32 %v217_v27, %v213_v28  ;;  %v748_v40 = vpop.eup %747 }
  0x8a   :  { %v214_v46 = vmul.f32 %v748_v40, %v204_v35  ;;  %v228_v63 = vmul.f32 %v213_v28, %v1059_v23 }
  0x8b   :  { %v229_v43 = vadd.f32 %v225_v36, %v221_v31  ;;  %v230_v44 = vadd.f32 %v226_v37, %v222_v33  ;;  %v231_v45 = vadd.f32 %v227_v38, %v223_v34  ;;  %v237_v47 = vmul.f32 %v218_v39, %v1086_v55 }
  0x8c   :  { %v238_v48 = vmul.f32 %v218_v39, %v1088_v56  ;;  %v239_v49 = vmul.f32 %v218_v39, %v1095_v61  ;;  %215 = vst [vmem:[#allocation10] sm:$0x1] %v214_v46  ;;  %v241_v54 = vmul.f32 %v214_v46, %v1080_v51  ;;  %v242_v60 = vmul.f32 %v214_v46, %v1082_v52 }
  0x8d   :  { %v233_v50 = vadd.f32 %v229_v43, %v1049_v14  ;;  %v234_v53 = vadd.f32 %v230_v44, %v1052_v18  ;;  %v235_v59 = vadd.f32 %v231_v45, %v1054_v20  ;;  %v243_v62 = vmul.f32 %v214_v46, %v1090_v57 }
  0x8e   :  { %v245_v0 = vadd.f32 %v241_v54, %v237_v47  ;;  %v246_v1 = vadd.f32 %v242_v60, %v238_v48  ;;  %v232_v12 = vadd.f32 %v228_v63, %v224_v58  ;;  %v240_v16 = vmul.f32 %v218_v39, %v1114_v25 }
  0x8f   :  { %749 = vtanh.f32 %v233_v50  ;;  %v247_v6 = vadd.f32 %v243_v62, %v239_v49  ;;  %v244_v17 = vmul.f32 %v214_v46, %v1118_v30  ;;  %v289_v62 = vld [vmem:[#allocation7 + $0x3] sm:$0x1] }
  0x90   :  { %751 = vtanh.f32 %v234_v53  ;;  %v249_v9 = vadd.f32 %v245_v0, %v1107_v19  ;;  %v250_v10 = vadd.f32 %v246_v1, %v1110_v21  ;;  %v236_v41 = vadd.f32 %v232_v12, %v1065_v29  ;;  %v286_v0 = vld [vmem:[#allocation8 + $0x2] sm:$0x1] }
  0x91   :  { %753 = vtanh.f32 %v235_v59  ;;  %v251_v15 = vadd.f32 %v247_v6, %v1120_v32  ;;  %v248_v24 = vadd.f32 %v244_v17, %v240_v16  ;;  %v290_v6 = vmul.f32 %v289_v62, %v1032_v2 }
  0x92   :  { %755 = vtanh.f32 %v249_v9  ;;  %v291_v9 = vmul.f32 %v289_v62, %v1034_v3 }
  0x93   :  { %757 = vtanh.f32 %v250_v10  ;;  %v252_v33 = vadd.f32 %v248_v24, %v1128_v42 }
  0x94   :  { %759 = vtanh.f32 %v251_v15 }
  0x95   :  { %761 = vtanh.f32 %v236_v41  ;;  %v292_v41 = vmul.f32 %v289_v62, %v1036_v4 }
  0x96   :  { %763 = vtanh.f32 %v252_v33 }
  0x99   :  { %v750_v26 = vpop.eup %749 }
  0x9a   :  { %v752_v27 = vpop.eup %751  ;;  %v261_v28 = vadd.f32 1.0, %v750_v26 }
  0x9b   :  { %v263_v31 = vadd.f32 1.0, %v752_v27  ;;  %v754_v34 = vpop.eup %753 }
  0x9c   :  { %v262_v35 = vmul.f32 0.5, %v261_v28  ;;  %v756_v36 = vpop.eup %755 }
  0x9d   :  { %v264_v37 = vmul.f32 0.5, %v263_v31  ;;  %v758_v38 = vpop.eup %757  ;;  %v267_v40 = vadd.f32 1.0, %v756_v36 }
  0x9e   :  { %v274_v39 = vmul.f32 %v754_v34, %v262_v35  ;;  %v269_v44 = vadd.f32 1.0, %v758_v38  ;;  %v760_v46 = vpop.eup %759 }
  0x9f   :  { %v273_v43 = vmul.f32 %v264_v37, %v1132_v5  ;;  %v268_v45 = vmul.f32 0.5, %v267_v40  ;;  %v762_v53 = vpop.eup %761 }
  0xa0   :  { %v270_v48 = vmul.f32 0.5, %v269_v44  ;;  %v265_v58 = vadd.f32 1.0, %v762_v53  ;;  %v764_v59 = vpop.eup %763 }
  0xa1   :  { %v1163_v47 = vadd.f32 %v274_v39, %v273_v43  ;;  %v277_v49 = vmul.f32 %v760_v46, %v268_v45  ;;  %v271_v60 = vadd.f32 1.0, %v764_v59 }
  0xa2   :  { %v276_v50 = vmul.f32 %v270_v48, %v1135_v13  ;;  %v266_v5 = vmul.f32 0.5, %v265_v58  ;;  %v293_v48 = vmul.f32 %v289_v62, %v1057_v22 }
  0xa3   :  { %765 = vtanh.f32 %v1163_v47  ;;  %v272_v10 = vmul.f32 0.5, %v271_v60 }
  0xa4   :  { %v1167_v54 = vadd.f32 %v277_v49, %v276_v50 }
  0xa6   :  { %767 = vtanh.f32 %v1167_v54 }
  0xad   :  { %v766_v63 = vpop.eup %765 }
  0xae   :  { %v281_v1 = vmul.f32 %v766_v63, %v266_v5 }
  0xb0   :  { %v287_v12 = vmul.f32 %v286_v0, %v281_v1  ;;  %v294_v13 = vmul.f32 %v281_v1, %v1040_v7  ;;  %v295_v15 = vmul.f32 %v281_v1, %v1042_v8  ;;  %v768_v16 = vpop.eup %767  ;;  %v296_v17 = vmul.f32 %v281_v1, %v1045_v11 }
  0xb1   :  { %v282_v24 = vmul.f32 %v768_v16, %v272_v10  ;;  %v297_v49 = vmul.f32 %v281_v1, %v1059_v23 }
  0xb2   :  { %v306_v26 = vmul.f32 %v287_v12, %v1086_v55  ;;  %v307_v27 = vmul.f32 %v287_v12, %v1088_v56  ;;  %v308_v28 = vmul.f32 %v287_v12, %v1095_v61  ;;  %v298_v31 = vadd.f32 %v294_v13, %v290_v6 }
  0xb3   :  { %v299_v33 = vadd.f32 %v295_v15, %v291_v9  ;;  %284 = vst [vmem:[#allocation10 + $0x1] sm:$0x1] %v282_v24  ;;  %v310_v34 = vmul.f32 %v282_v24, %v1080_v51  ;;  %v311_v35 = vmul.f32 %v282_v24, %v1082_v52  ;;  %v312_v36 = vmul.f32 %v282_v24, %v1090_v57 }
  0xb4   :  { %v300_v37 = vadd.f32 %v296_v17, %v292_v41  ;;  %v302_v38 = vadd.f32 %v298_v31, %v1049_v14  ;;  %v309_v58 = vmul.f32 %v287_v12, %v1114_v25  ;;  %v313_v59 = vmul.f32 %v282_v24, %v1118_v30 }
  0xb5   :  { %v303_v39 = vadd.f32 %v299_v33, %v1052_v18  ;;  %v314_v40 = vadd.f32 %v310_v34, %v306_v26  ;;  %v315_v43 = vadd.f32 %v311_v35, %v307_v27  ;;  %v316_v44 = vadd.f32 %v312_v36, %v308_v28 }
  0xb6   :  { %769 = vtanh.f32 %v302_v38  ;;  %v304_v50 = vadd.f32 %v300_v37, %v1054_v20  ;;  %v301_v5 = vadd.f32 %v297_v49, %v293_v48  ;;  %v317_v60 = vadd.f32 %v313_v59, %v309_v58 }
  0xb7   :  { %v318_v45 = vadd.f32 %v314_v40, %v1107_v19  ;;  %v319_v46 = vadd.f32 %v315_v43, %v1110_v21  ;;  %771 = vtanh.f32 %v303_v39  ;;  %v320_v53 = vadd.f32 %v316_v44, %v1120_v32  ;;  %v358_v44 = vld [vmem:[#allocation7 + $0x4] sm:$0x1] }
  0xb8   :  { %v305_v63 = vadd.f32 %v301_v5, %v1065_v29  ;;  %v321_v0 = vadd.f32 %v317_v60, %v1128_v42 }
  0xb9   :  { %773 = vtanh.f32 %v318_v45 }
  0xba   :  { %775 = vtanh.f32 %v319_v46 }
  0xbb   :  { %777 = vtanh.f32 %v304_v50  ;;  %v359_v50 = vmul.f32 %v358_v44, %v1032_v2 }
  0xbc   :  { %779 = vtanh.f32 %v320_v53 }
  0xbd   :  { %781 = vtanh.f32 %v305_v63  ;;  %v361_v63 = vmul.f32 %v358_v44, %v1036_v4 }
  0xbe   :  { %783 = vtanh.f32 %v321_v0 }
  0xc0   :  { %v770_v62 = vpop.eup %769 }
  0xc1   :  { %v330_v1 = vadd.f32 1.0, %v770_v62  ;;  %v772_v6 = vpop.eup %771 }
  0xc2   :  { %v332_v13 = vadd.f32 1.0, %v772_v6 }
  0xc3   :  { %v774_v9 = vpop.eup %773  ;;  %v331_v10 = vmul.f32 0.5, %v330_v1 }
  0xc4   :  { %v776_v15 = vpop.eup %775  ;;  %v336_v12 = vadd.f32 1.0, %v774_v9  ;;  %v333_v16 = vmul.f32 0.5, %v332_v13 }
  0xc5   :  { %v338_v17 = vadd.f32 1.0, %v776_v15  ;;  %v778_v41 = vpop.eup %777 }
  0xc6   :  { %v337_v24 = vmul.f32 0.5, %v336_v12  ;;  %v780_v26 = vpop.eup %779  ;;  %v342_v28 = vmul.f32 %v333_v16, %v1163_v47  ;;  %v343_v31 = vmul.f32 %v778_v41, %v331_v10  ;;  %v355_v47 = vld [vmem:[#allocation8 + $0x3] sm:$0x1] }
  0xc7   :  { %v339_v27 = vmul.f32 0.5, %v338_v17  ;;  %v782_v37 = vpop.eup %781 }
  0xc8   :  { %v346_v33 = vmul.f32 %v780_v26, %v337_v24  ;;  %v1195_v34 = vadd.f32 %v343_v31, %v342_v28  ;;  %v784_v38 = vpop.eup %783  ;;  %v334_v39 = vadd.f32 1.0, %v782_v37 }
  0xc9   :  { %v345_v35 = vmul.f32 %v339_v27, %v1167_v54  ;;  %v340_v40 = vadd.f32 1.0, %v784_v38  ;;  %v360_v54 = vmul.f32 %v358_v44, %v1034_v3  ;;  %v362_v38 = vmul.f32 %v358_v44, %v1057_v22 }
  0xca   :  { %785 = vtanh.f32 %v1195_v34  ;;  %v335_v43 = vmul.f32 0.5, %v334_v39 }
  0xcb   :  { %v1198_v36 = vadd.f32 %v346_v33, %v345_v35  ;;  %v341_v46 = vmul.f32 0.5, %v340_v40 }
  0xcd   :  { %787 = vtanh.f32 %v1198_v36 }
  0xd4   :  { %v786_v45 = vpop.eup %785 }
  0xd5   :  { %v350_v48 = vmul.f32 %v786_v45, %v335_v43 }
  0xd7   :  { %v788_v49 = vpop.eup %787  ;;  %v356_v58 = vmul.f32 %v355_v47, %v350_v48  ;;  %v363_v59 = vmul.f32 %v350_v48, %v1040_v7  ;;  %v364_v5 = vmul.f32 %v350_v48, %v1042_v8  ;;  %v365_v60 = vmul.f32 %v350_v48, %v1045_v11 }
  0xd8   :  { %v351_v53 = vmul.f32 %v788_v49, %v341_v46  ;;  %v366_v39 = vmul.f32 %v350_v48, %v1059_v23 }
  0xd9   :  { %v375_v62 = vmul.f32 %v356_v58, %v1086_v55  ;;  %v376_v0 = vmul.f32 %v356_v58, %v1088_v56  ;;  %v377_v1 = vmul.f32 %v356_v58, %v1095_v61  ;;  %v367_v13 = vadd.f32 %v363_v59, %v359_v50 }
  0xda   :  { %353 = vst [vmem:[#allocation10 + $0x2] sm:$0x1] %v351_v53  ;;  %v379_v6 = vmul.f32 %v351_v53, %v1080_v51  ;;  %v380_v9 = vmul.f32 %v351_v53, %v1082_v52  ;;  %v381_v10 = vmul.f32 %v351_v53, %v1090_v57  ;;  %v368_v15 = vadd.f32 %v364_v5, %v360_v54 }
  0xdb   :  { %v369_v41 = vadd.f32 %v365_v60, %v361_v63  ;;  %v371_v24 = vadd.f32 %v367_v13, %v1049_v14  ;;  %v378_v33 = vmul.f32 %v356_v58, %v1114_v25  ;;  %v382_v35 = vmul.f32 %v351_v53, %v1118_v30 }
  0xdc   :  { %v383_v12 = vadd.f32 %v379_v6, %v375_v62  ;;  %v384_v16 = vadd.f32 %v380_v9, %v376_v0  ;;  %v385_v17 = vadd.f32 %v381_v10, %v377_v1  ;;  %v372_v28 = vadd.f32 %v368_v15, %v1052_v18 }
  0xdd   :  { %789 = vtanh.f32 %v371_v24  ;;  %v373_v37 = vadd.f32 %v369_v41, %v1054_v20  ;;  %v386_v40 = vadd.f32 %v382_v35, %v378_v33  ;;  %v370_v43 = vadd.f32 %v366_v39, %v362_v38  ;;  %v424_v33 = vld [vmem:[#allocation8 + $0x4] sm:$0x1] }
  0xde   :  { %v387_v26 = vadd.f32 %v383_v12, %v1107_v19  ;;  %v388_v27 = vadd.f32 %v384_v16, %v1110_v21  ;;  %v389_v31 = vadd.f32 %v385_v17, %v1120_v32 }
  0xdf   :  { %v390_v45 = vadd.f32 %v386_v40, %v1128_v42  ;;  %v374_v49 = vadd.f32 %v370_v43, %v1065_v29 }
  0xe0   :  { %791 = vtanh.f32 %v387_v26 }
  0xe1   :  { %793 = vtanh.f32 %v388_v27  ;;  %v427_v27 = vld [vmem:[#allocation7 + $0x5] sm:$0x1] }
  0xe2   :  { %795 = vtanh.f32 %v372_v28  ;;  %v428_v35 = vmul.f32 %v427_v27, %v1032_v2  ;;  %v430_v43 = vmul.f32 %v427_v27, %v1036_v4 }
  0xe3   :  { %797 = vtanh.f32 %v389_v31 }
  0xe4   :  { %799 = vtanh.f32 %v373_v37  ;;  %v429_v37 = vmul.f32 %v427_v27, %v1034_v3 }
  0xe5   :  { %801 = vtanh.f32 %v390_v45 }
  0xe6   :  { %803 = vtanh.f32 %v374_v49 }
  0xe7   :  { %v790_v47 = vpop.eup %789 }
  0xe8   :  { %v399_v50 = vadd.f32 1.0, %v790_v47 }
  0xea   :  { %v792_v46 = vpop.eup %791  ;;  %v400_v58 = vmul.f32 0.5, %v399_v50 }
  0xeb   :  { %v794_v54 = vpop.eup %793  ;;  %v405_v53 = vadd.f32 1.0, %v792_v46 }
  0xec   :  { %v407_v59 = vadd.f32 1.0, %v794_v54  ;;  %v796_v44 = vpop.eup %795 }
  0xed   :  { %v406_v5 = vmul.f32 0.5, %v405_v53  ;;  %v798_v48 = vpop.eup %797  ;;  %v401_v60 = vadd.f32 1.0, %v796_v44 }
  0xee   :  { %v408_v63 = vmul.f32 0.5, %v407_v59  ;;  %v800_v62 = vpop.eup %799 }
  0xef   :  { %v415_v0 = vmul.f32 %v798_v48, %v406_v5  ;;  %v402_v1 = vmul.f32 0.5, %v401_v60  ;;  %v412_v6 = vmul.f32 %v800_v62, %v400_v58  ;;  %v802_v12 = vpop.eup %801  ;;  %v431_v62 = vmul.f32 %v427_v27, %v1057_v22 }
  0xf0   :  { %v414_v9 = vmul.f32 %v408_v63, %v1198_v36  ;;  %v804_v16 = vpop.eup %803  ;;  %v409_v17 = vadd.f32 1.0, %v802_v12 }
  0xf1   :  { %v411_v10 = vmul.f32 %v402_v1, %v1195_v34  ;;  %v403_v41 = vadd.f32 1.0, %v804_v16 }
  0xf2   :  { %v1228_v13 = vadd.f32 %v415_v0, %v414_v9  ;;  %v410_v24 = vmul.f32 0.5, %v409_v17 }
  0xf3   :  { %v1230_v15 = vadd.f32 %v412_v6, %v411_v10  ;;  %v404_v28 = vmul.f32 0.5, %v403_v41 }
  0xf4   :  { %805 = vtanh.f32 %v1228_v13 }
  0xf5   :  { %807 = vtanh.f32 %v1230_v15 }
  0xfe   :  { %v806_v26 = vpop.eup %805 }
  0xff   :  { %v420_v31 = vmul.f32 %v806_v26, %v410_v24  ;;  %v808_v36 = vpop.eup %807 }
 0x100   :  { %v419_v34 = vmul.f32 %v808_v36, %v404_v28 }
 0x101   :  { %422 = vst [vmem:[#allocation10 + $0x3] sm:$0x1] %v420_v31  ;;  %v448_v38 = vmul.f32 %v420_v31, %v1080_v51  ;;  %v449_v39 = vmul.f32 %v420_v31, %v1082_v52  ;;  %v450_v40 = vmul.f32 %v420_v31, %v1090_v57  ;;  %v451_v17 = vmul.f32 %v420_v31, %v1118_v30 }
 0x102   :  { %v425_v45 = vmul.f32 %v424_v33, %v419_v34  ;;  %v432_v47 = vmul.f32 %v419_v34, %v1040_v7  ;;  %v433_v46 = vmul.f32 %v419_v34, %v1042_v8  ;;  %v434_v49 = vmul.f32 %v419_v34, %v1045_v11 }
 0x103   :  { %v435_v9 = vmul.f32 %v419_v34, %v1059_v23 }
 0x104   :  { %v444_v50 = vmul.f32 %v425_v45, %v1086_v55  ;;  %v445_v54 = vmul.f32 %v425_v45, %v1088_v56  ;;  %v446_v53 = vmul.f32 %v425_v45, %v1095_v61  ;;  %v436_v58 = vadd.f32 %v432_v47, %v428_v35 }
 0x105   :  { %v437_v59 = vadd.f32 %v433_v46, %v429_v37  ;;  %v438_v44 = vadd.f32 %v434_v49, %v430_v43  ;;  %v447_v16 = vmul.f32 %v425_v45, %v1114_v25  ;;  %v439_v41 = vadd.f32 %v435_v9, %v431_v62 }
 0x106   :  { %v452_v5 = vadd.f32 %v448_v38, %v444_v50  ;;  %v453_v48 = vadd.f32 %v449_v39, %v445_v54  ;;  %v454_v60 = vadd.f32 %v450_v40, %v446_v53  ;;  %v440_v63 = vadd.f32 %v436_v58, %v1049_v14 }
 0x107   :  { %v441_v0 = vadd.f32 %v437_v59, %v1052_v18  ;;  %v442_v10 = vadd.f32 %v438_v44, %v1054_v20  ;;  %v455_v24 = vadd.f32 %v451_v17, %v447_v16  ;;  %v443_v26 = vadd.f32 %v439_v41, %v1065_v29 }
 0x108   :  { %v456_v1 = vadd.f32 %v452_v5, %v1107_v19  ;;  %v457_v6 = vadd.f32 %v453_v48, %v1110_v21  ;;  %809 = vtanh.f32 %v440_v63  ;;  %v458_v12 = vadd.f32 %v454_v60, %v1120_v32 }
 0x109   :  { %811 = vtanh.f32 %v441_v0  ;;  %v459_v28 = vadd.f32 %v455_v24, %v1128_v42  ;;  %v493_v0 = vld [vmem:[#allocation8 + $0x5] sm:$0x1] }
 0x10a   :  { %813 = vtanh.f32 %v456_v1 }
 0x10b   :  { %815 = vtanh.f32 %v457_v6 }
 0x10c   :  { %817 = vtanh.f32 %v442_v10 }
 0x10d   :  { %819 = vtanh.f32 %v458_v12 }
 0x10e   :  { %821 = vtanh.f32 %v443_v26 }
 0x10f   :  { %823 = vtanh.f32 %v459_v28 }
 0x112   :  { %v810_v27 = vpop.eup %809 }
 0x113   :  { %v812_v36 = vpop.eup %811  ;;  %v468_v33 = vadd.f32 1.0, %v810_v27 }
 0x114   :  { %v814_v34 = vpop.eup %813  ;;  %v470_v35 = vadd.f32 1.0, %v812_v36 }
 0x115   :  { %v816_v37 = vpop.eup %815  ;;  %v469_v38 = vmul.f32 0.5, %v468_v33  ;;  %v474_v39 = vadd.f32 1.0, %v814_v34 }
 0x116   :  { %v471_v31 = vmul.f32 0.5, %v470_v35  ;;  %v476_v40 = vadd.f32 1.0, %v816_v37  ;;  %v818_v43 = vpop.eup %817 }
 0x117   :  { %v475_v45 = vmul.f32 0.5, %v474_v39  ;;  %v820_v47 = vpop.eup %819  ;;  %v481_v50 = vmul.f32 %v818_v43, %v469_v38 }
 0x118   :  { %v477_v46 = vmul.f32 0.5, %v476_v40  ;;  %v480_v49 = vmul.f32 %v471_v31, %v1230_v15  ;;  %v822_v44 = vpop.eup %821  ;;  %v496_v15 = vld [vmem:[#allocation7 + $0x6] sm:$0x1] }
 0x119   :  { %v484_v54 = vmul.f32 %v820_v47, %v475_v45  ;;  %v824_v5 = vpop.eup %823  ;;  %v472_v48 = vadd.f32 1.0, %v822_v44  ;;  %v498_v17 = vmul.f32 %v496_v15, %v1034_v3  ;;  %v499_v35 = vmul.f32 %v496_v15, %v1036_v4 }
 0x11a   :  { %v1259_v53 = vadd.f32 %v481_v50, %v480_v49  ;;  %v483_v58 = vmul.f32 %v477_v46, %v1228_v13  ;;  %v478_v60 = vadd.f32 1.0, %v824_v5  ;;  %v497_v13 = vmul.f32 %v496_v15, %v1032_v2 }
 0x11b   :  { %v473_v63 = vmul.f32 0.5, %v472_v48  ;;  %v500_v44 = vmul.f32 %v496_v15, %v1057_v22 }
 0x11c   :  { %v1262_v59 = vadd.f32 %v484_v54, %v483_v58  ;;  %825 = vtanh.f32 %v1259_v53  ;;  %v479_v1 = vmul.f32 0.5, %v478_v60 }
 0x11e   :  { %827 = vtanh.f32 %v1262_v59 }
 0x126   :  { %v826_v62 = vpop.eup %825 }
 0x127   :  { %v488_v6 = vmul.f32 %v826_v62, %v473_v63 }
 0x128   :  { %v828_v9 = vpop.eup %827 }
 0x129   :  { %v489_v10 = vmul.f32 %v828_v9, %v479_v1  ;;  %v494_v12 = vmul.f32 %v493_v0, %v488_v6  ;;  %v501_v16 = vmul.f32 %v488_v6, %v1040_v7  ;;  %v502_v41 = vmul.f32 %v488_v6, %v1042_v8 }
 0x12a   :  { %v503_v37 = vmul.f32 %v488_v6, %v1045_v11  ;;  %v504_v48 = vmul.f32 %v488_v6, %v1059_v23 }
 0x12b   :  { %491 = vst [vmem:[#allocation10 + $0x4] sm:$0x1] %v489_v10  ;;  %v513_v24 = vmul.f32 %v494_v12, %v1086_v55  ;;  %v514_v26 = vmul.f32 %v494_v12, %v1088_v56  ;;  %v515_v27 = vmul.f32 %v494_v12, %v1095_v61  ;;  %v517_v28 = vmul.f32 %v489_v10, %v1080_v51 }
 0x12c   :  { %v518_v36 = vmul.f32 %v489_v10, %v1082_v52  ;;  %v519_v33 = vmul.f32 %v489_v10, %v1090_v57  ;;  %v505_v38 = vadd.f32 %v501_v16, %v497_v13  ;;  %v506_v40 = vadd.f32 %v502_v41, %v498_v17 }
 0x12d   :  { %v521_v34 = vadd.f32 %v517_v28, %v513_v24  ;;  %v516_v46 = vmul.f32 %v494_v12, %v1114_v25  ;;  %v520_v49 = vmul.f32 %v489_v10, %v1118_v30  ;;  %v507_v50 = vadd.f32 %v503_v37, %v499_v35 }
 0x12e   :  { %v522_v39 = vadd.f32 %v518_v36, %v514_v26  ;;  %v523_v31 = vadd.f32 %v519_v33, %v515_v27  ;;  %v509_v54 = vadd.f32 %v505_v38, %v1049_v14  ;;  %v510_v58 = vadd.f32 %v506_v40, %v1052_v18 }
 0x12f   :  { %v525_v43 = vadd.f32 %v521_v34, %v1107_v19  ;;  %v524_v5 = vadd.f32 %v520_v49, %v516_v46  ;;  %v511_v60 = vadd.f32 %v507_v50, %v1054_v20  ;;  %v508_v62 = vadd.f32 %v504_v48, %v500_v44  ;;  %v565_v46 = vld [vmem:[#allocation7 + $0x7] sm:$0x1] }
 0x130   :  { %v526_v45 = vadd.f32 %v522_v39, %v1110_v21  ;;  %v527_v47 = vadd.f32 %v523_v31, %v1120_v32  ;;  %v568_v44 = vmul.f32 %v565_v46, %v1036_v4 }
 0x131   :  { %829 = vtanh.f32 %v525_v43  ;;  %v528_v63 = vadd.f32 %v524_v5, %v1128_v42  ;;  %v512_v12 = vadd.f32 %v508_v62, %v1065_v29  ;;  %v562_v5 = vld [vmem:[#allocation8 + $0x6] sm:$0x1] }
 0x132   :  { %831 = vtanh.f32 %v526_v45 }
 0x133   :  { %833 = vtanh.f32 %v527_v47 }
 0x134   :  { %835 = vtanh.f32 %v509_v54 }
 0x135   :  { %837 = vtanh.f32 %v510_v58  ;;  %v566_v58 = vmul.f32 %v565_v46, %v1032_v2 }
 0x136   :  { %839 = vtanh.f32 %v511_v60 }
 0x137   :  { %841 = vtanh.f32 %v528_v63 }
 0x138   :  { %843 = vtanh.f32 %v512_v12 }
 0x13b   :  { %v830_v0 = vpop.eup %829 }
 0x13c   :  { %v832_v1 = vpop.eup %831  ;;  %v543_v9 = vadd.f32 1.0, %v830_v0 }
 0x13d   :  { %v545_v10 = vadd.f32 1.0, %v832_v1  ;;  %v834_v13 = vpop.eup %833 }
 0x13e   :  { %v544_v15 = vmul.f32 0.5, %v543_v9  ;;  %v836_v16 = vpop.eup %835 }
 0x13f   :  { %v546_v17 = vmul.f32 0.5, %v545_v10  ;;  %v838_v6 = vpop.eup %837  ;;  %v537_v24 = vadd.f32 1.0, %v836_v16 }
 0x140   :  { %v553_v41 = vmul.f32 %v834_v13, %v544_v15  ;;  %v539_v27 = vadd.f32 1.0, %v838_v6  ;;  %v840_v36 = vpop.eup %839 }
 0x141   :  { %v552_v26 = vmul.f32 %v546_v17, %v1262_v59  ;;  %v538_v28 = vmul.f32 0.5, %v537_v24  ;;  %v842_v38 = vpop.eup %841  ;;  %v569_v17 = vmul.f32 %v565_v46, %v1057_v22 }
 0x142   :  { %v540_v34 = vmul.f32 0.5, %v539_v27  ;;  %v547_v31 = vadd.f32 1.0, %v842_v38  ;;  %v844_v40 = vpop.eup %843 }
 0x143   :  { %v1291_v33 = vadd.f32 %v553_v41, %v552_v26  ;;  %v550_v35 = vmul.f32 %v840_v36, %v538_v28  ;;  %v541_v43 = vadd.f32 1.0, %v844_v40 }
 0x144   :  { %v549_v37 = vmul.f32 %v540_v34, %v1259_v53  ;;  %v548_v59 = vmul.f32 0.5, %v547_v31  ;;  %v567_v53 = vmul.f32 %v565_v46, %v1034_v3 }
 0x145   :  { %845 = vtanh.f32 %v1291_v33  ;;  %v542_v49 = vmul.f32 0.5, %v541_v43 }
 0x146   :  { %v1295_v39 = vadd.f32 %v550_v35, %v549_v37 }
 0x148   :  { %847 = vtanh.f32 %v1295_v39 }
 0x14f   :  { %v846_v45 = vpop.eup %845 }
 0x150   :  { %v558_v47 = vmul.f32 %v846_v45, %v548_v59 }
 0x152   :  { %560 = vst [vmem:[#allocation10 + $0x5] sm:$0x1] %v558_v47  ;;  %v848_v50 = vpop.eup %847  ;;  %v586_v62 = vmul.f32 %v558_v47, %v1080_v51  ;;  %v587_v0 = vmul.f32 %v558_v47, %v1082_v52  ;;  %v588_v9 = vmul.f32 %v558_v47, %v1090_v57 }
 0x153   :  { %v557_v54 = vmul.f32 %v848_v50, %v542_v49 }
 0x155   :  { %v570_v48 = vmul.f32 %v557_v54, %v1040_v7  ;;  %v571_v60 = vmul.f32 %v557_v54, %v1042_v8  ;;  %v572_v63 = vmul.f32 %v557_v54, %v1045_v11  ;;  %v563_v1 = vmul.f32 %v562_v5, %v557_v54 }
 0x156   :  { %v573_v6 = vmul.f32 %v557_v54, %v1059_v23 }
 0x157   :  { %v574_v10 = vadd.f32 %v570_v48, %v566_v58  ;;  %v575_v2 = vadd.f32 %v571_v60, %v567_v53  ;;  %v576_v12 = vadd.f32 %v572_v63, %v568_v44  ;;  %v582_v3 = vmul.f32 %v563_v1, %v1086_v55 }
 0x158   :  { %v583_v4 = vmul.f32 %v563_v1, %v1088_v56  ;;  %v584_v7 = vmul.f32 %v563_v1, %v1095_v61  ;;  %v577_v27 = vadd.f32 %v573_v6, %v569_v17 }
 0x159   :  { %v578_v8 = vadd.f32 %v574_v10, %v1049_v14  ;;  %v579_v11 = vadd.f32 %v575_v2, %v1052_v18  ;;  %v580_v13 = vadd.f32 %v576_v12, %v1054_v20  ;;  %v590_v15 = vadd.f32 %v586_v62, %v582_v3 }
 0x15a   :  { %v591_v16 = vadd.f32 %v587_v0, %v583_v4  ;;  %v592_v41 = vadd.f32 %v588_v9, %v584_v7  ;;  %v589_v14 = vmul.f32 %v558_v47, %v1118_v30  ;;  %v585_v18 = vmul.f32 %v563_v1, %v1114_v25 }
 0x15b   :  { %849 = vtanh.f32 %v578_v8  ;;  %v594_v24 = vadd.f32 %v590_v15, %v1107_v19  ;;  %v581_v22 = vadd.f32 %v577_v27, %v1065_v29 }
 0x15c   :  { %851 = vtanh.f32 %v579_v11  ;;  %v595_v26 = vadd.f32 %v591_v16, %v1110_v21  ;;  %v596_v20 = vadd.f32 %v592_v41, %v1120_v32  ;;  %v593_v28 = vadd.f32 %v589_v14, %v585_v18 }
 0x15d   :  { %853 = vtanh.f32 %v580_v13 }
 0x15e   :  { %855 = vtanh.f32 %v594_v24  ;;  %v597_v37 = vadd.f32 %v593_v28, %v1128_v42 }
 0x15f   :  { %857 = vtanh.f32 %v595_v26 }
 0x160   :  { %859 = vtanh.f32 %v596_v20 }
 0x161   :  { %861 = vtanh.f32 %v581_v22 }
 0x162   :  { %863 = vtanh.f32 %v597_v37 }
 0x165   :  { %v850_v23 = vpop.eup %849 }
 0x166   :  { %v852_v36 = vpop.eup %851  ;;  %v606_v34 = vadd.f32 1.0, %v850_v23 }
 0x167   :  { %v608_v35 = vadd.f32 1.0, %v852_v36  ;;  %v854_v38 = vpop.eup %853 }
 0x168   :  { %v607_v31 = vmul.f32 0.5, %v606_v34  ;;  %v856_v40 = vpop.eup %855 }
 0x169   :  { %v609_v59 = vmul.f32 0.5, %v608_v35  ;;  %v858_v43 = vpop.eup %857  ;;  %v612_v47 = vadd.f32 1.0, %v856_v40 }
 0x16a   :  { %v619_v45 = vmul.f32 %v854_v38, %v607_v31  ;;  %v614_v29 = vadd.f32 1.0, %v858_v43  ;;  %v860_v50 = vpop.eup %859 }
 0x16b   :  { %v618_v46 = vmul.f32 %v609_v59, %v1295_v39  ;;  %v613_v49 = vmul.f32 0.5, %v612_v47  ;;  %v862_v5 = vpop.eup %861  ;;  %v631_v39 = vld [vmem:[#allocation8 + $0x7] sm:$0x1] }
 0x16c   :  { %v615_v58 = vmul.f32 0.5, %v614_v29  ;;  %v610_v60 = vadd.f32 1.0, %v862_v5  ;;  %v864_v63 = vpop.eup %863 }
 0x16d   :  { %v620_v54 = vadd.f32 %v619_v45, %v618_v46  ;;  %v622_v53 = vmul.f32 %v860_v50, %v613_v49  ;;  %v616_v0 = vadd.f32 1.0, %v864_v63 }
 0x16e   :  { %v621_v44 = vmul.f32 %v615_v58, %v1291_v33  ;;  %v611_v62 = vmul.f32 0.5, %v610_v60 }
 0x16f   :  { %865 = vtanh.f32 %v620_v54  ;;  %667 = vst [vmem:[#allocation2 + $0x1] sm:$0x1] %v620_v54  ;;  %v617_v2 = vmul.f32 0.5, %v616_v0 }
 0x170   :  { %v623_v48 = vadd.f32 %v622_v53, %v621_v44 }
 0x172   :  { %867 = vtanh.f32 %v623_v48 }
 0x179   :  { %v866_v1 = vpop.eup %865 }
 0x17a   :  { %v626_v9 = vmul.f32 %v866_v1, %v611_v62 }
 0x17c   :  { %v632_v10 = vmul.f32 %v631_v39, %v626_v9  ;;  %666 = vst [vmem:[#allocation2] sm:$0x1] %v626_v9  ;;  %v868_v12 = vpop.eup %867 }
 0x17d   :  { %v627_v7 = vmul.f32 %v868_v12, %v617_v2 }
 0x17e   :  { %v633_v3 = vmul.f32 %v632_v10, %v1086_v55  ;;  %v634_v4 = vmul.f32 %v632_v10, %v1088_v56  ;;  %v635_v33 = vmul.f32 %v632_v10, %v1095_v61  ;;  %v636_v56 = vmul.f32 %v632_v10, %v1114_v25 }
 0x17f   :  { %629 = vst [vmem:[#allocation10 + $0x6] sm:$0x1] %v627_v7  ;;  %v637_v8 = vmul.f32 %v627_v7, %v1080_v51  ;;  %v638_v11 = vmul.f32 %v627_v7, %v1082_v52  ;;  %v639_v13 = vmul.f32 %v627_v7, %v1090_v57  ;;  %v640_v61 = vmul.f32 %v627_v7, %v1118_v30 }
 0x181   :  { %v641_v15 = vadd.f32 %v637_v8, %v633_v3  ;;  %v642_v16 = vadd.f32 %v638_v11, %v634_v4  ;;  %v643_v17 = vadd.f32 %v639_v13, %v635_v33  ;;  %v644_v51 = vadd.f32 %v640_v61, %v636_v56 }
 0x183   :  { %v645_v6 = vadd.f32 %v641_v15, %v1107_v19  ;;  %v646_v41 = vadd.f32 %v642_v16, %v1110_v21  ;;  %v647_v55 = vadd.f32 %v643_v17, %v1120_v32  ;;  %v648_v52 = vadd.f32 %v644_v51, %v1128_v42 }
 0x185   :  { %869 = vtanh.f32 %v645_v6 }
 0x186   :  { %871 = vtanh.f32 %v646_v41 }
 0x187   :  { %873 = vtanh.f32 %v647_v55 }
 0x188   :  { %875 = vtanh.f32 %v648_v52 }
 0x18f   :  { %v870_v57 = vpop.eup %869 }
 0x190   :  { %v872_v24 = vpop.eup %871  ;;  %v653_v26 = vadd.f32 1.0, %v870_v57 }
 0x191   :  { %v655_v14 = vadd.f32 1.0, %v872_v24  ;;  %v874_v27 = vpop.eup %873 }
 0x192   :  { %v654_v19 = vmul.f32 0.5, %v653_v26  ;;  %v876_v25 = vpop.eup %875 }
 0x193   :  { %v656_v21 = vmul.f32 0.5, %v655_v14  ;;  %v657_v30 = vadd.f32 1.0, %v876_v25 }
 0x194   :  { %v660_v18 = vmul.f32 %v874_v27, %v654_v19 }
 0x195   :  { %v659_v32 = vmul.f32 %v656_v21, %v623_v48  ;;  %v658_v22 = vmul.f32 0.5, %v657_v30 }
 0x197   :  { %v661_v20 = vadd.f32 %v660_v18, %v659_v32 }
 0x199   :  { %877 = vtanh.f32 %v661_v20  ;;  %669 = vst [vmem:[#allocation2 + $0x3] sm:$0x1] %v661_v20 }
 0x1a3   :  { %v878_v28 = vpop.eup %877 }
 0x1a4   :  { %v663_v42 = vmul.f32 %v878_v28, %v658_v22 }
 0x1a6   :  { %665 = vst [vmem:[#allocation10 + $0x7] sm:$0x1] %v663_v42  ;;  %668 = vst [vmem:[#allocation2 + $0x2] sm:$0x1] %v663_v42 }
 0x1a7   :  { %944 = shalt.err (!%p941_p9)
}
 0x1a8   :  { %s945_s20 = scalar_lea.hbm %s1354_s3, 128 }
 0x1a9   :  { %p946_p10 = scmp.ne.s32.totalorder %s1354_s3, %s945_s20  ;;  %p949_p11 = scmp.lt.u32.totalorder %s945_s20, %s1354_s3 }
 0x1ab   :  { %p951_p12 = pnand %p949_p11, %p946_p10 }
 0x1ad   :  { %954 = shalt.err (!%p951_p12)
}
 0x1ae   :  { %681 = dma.vmem_to_hbm [thread:$0]  %s676_s17, 128, %s1354_s3, [#allocation5], %s965_s0, %s965_s0, %s966_s5  }
 0x1af   :  { %961 = dma.done.wait [#allocation5], 128  }
 0x1b0   :  { %962 = vsyncadd [#allocation5], 4294967168 }
 0x1b1   :  { %685 = vsyncpa [#allocation4], 1 }
 0x1b2   :  { %686 = vsyncpa [#allocation9], 1 }
 0x1b3   :  { %687 = vsyncpa [#allocation5], 1 }
 0x1b4   :  { %688 = vsyncpa [#allocation6], 1 }

</bundles_post_ra>
